<compile_context>
chip_gen: v7x
topology: tpu7x:2x2x1
jax: 0.10.0
libtpu: 0.0.40
codegen_flags: <defaults>
</compile_context>

<pallas_src>
import functools

import jax
import jax.numpy as jnp
from jax.experimental import pallas as pl
from jax.experimental.pallas import tpu as pltpu

# Plain Python float (NOT a jnp array — jnp constants captured by the kernel
# closure caused the previous "captures constants" trace error). -inf exactly
# reproduces PyTorch masked_fill_(-inf) semantics, including NaN on rows that
# are fully masked (same as the reference module).
_MASK_FILL = float("-inf")


def _qkv_attention2_kernel(q_ref, enc_ref, hist_ref, mask_ref,
                           we_ref, whis_ref, vt_ref,
                           out_ref, scores_ref,
                           *, s_chunk, compute_dtype):
    """scores = tanh(Q + enc@W_enc + hist*W_his) . vt  ->  masked softmax over S.

    Per grid step:
      q_ref      (tb, D)    f32   Q = dec@W_dec + bias, precomputed in XLA
      enc_ref    (tb, S, D) f32   cast to bf16 in-kernel for the MXU
      hist_ref   (tb, S)    f32
      mask_ref   (tb, S)    int32 (nonzero = masked)
      we_ref     (D, D)     bf16
      whis_ref   (1, D)     f32
      vt_ref     (1, D)     f32
      out_ref    (tb, S)    f32   lane-dense softmax output
      scores_ref (tb, S)    f32   VMEM scratch (persists across the chunk loop)
    """
    tb, s, d = enc_ref.shape
    n_chunks = s // s_chunk

    # Chunk-invariant values / broadcasts hoisted out of the loop
    # (JAX does not CSE broadcast_in_dim).
    we = we_ref[...]                                              # (D, D) bf16
    q_b = q_ref[...].astype(compute_dtype)[:, None, :]            # (tb, 1, D)
    whis_b = whis_ref[...].astype(compute_dtype).reshape(1, 1, d)  # (1, 1, D)
    vt_b = vt_ref[...].reshape(1, 1, d)                           # f32: D-reduction stays f32

    # ---- S-chunked score computation into the (tb, S) scratch ---------------
    for c in range(n_chunks):                  # static, fully unrolled chunk loop
        lo = c * s_chunk
        enc_c = enc_ref[:, lo:lo + s_chunk, :].astype(jnp.bfloat16)   # in-kernel MXU cast
        # Fold (tb, chunk) into the MXU M dimension; f32 accumulation.
        k = jnp.dot(enc_c.reshape(tb * s_chunk, d), we,
                    preferred_element_type=jnp.float32)
        k = k.reshape(tb, s_chunk, d).astype(compute_dtype)
        # Coverage term: rank-1 outer product on the VPU.
        his = hist_ref[:, lo:lo + s_chunk].astype(compute_dtype)[:, :, None] * whis_b
        all_v = jnp.tanh(q_b + k + his)                           # EUP tanh
        scores_ref[:, lo:lo + s_chunk] = jnp.sum(
            all_v.astype(jnp.float32) * vt_b, axis=-1)            # f32 reduction over D

    # ---- mask + numerically stable softmax over the full lane-dense (tb, S) --
    scores = jnp.where(mask_ref[...] != 0, _MASK_FILL, scores_ref[...])
    m = jnp.max(scores, axis=-1, keepdims=True)
    e = jnp.exp(scores - m)
    out_ref[...] = e / jnp.sum(e, axis=-1, keepdims=True)


# ----------------------------------------------------------------------------
# Wrapper-side sizing helpers
# ----------------------------------------------------------------------------
def _chip_kind():
    try:
        return jax.devices()[0].device_kind.lower()
    except Exception:
        return ""


def _vmem_budget_and_limit():
    """(tile-sizing budget, vmem_limit_bytes) per chip generation."""
    kind = _chip_kind()
    if "v7" in kind:                   # 64 MiB physical VMEM per TensorCore
        return 40 << 20, 56 << 20
    if "v5" in kind or "v6" in kind:   # 128 MiB physical VMEM
        return 80 << 20, 100 << 20
    return 40 << 20, 64 << 20          # unknown / interpret: conservative


def _elementwise_dtype():
    kind = _chip_kind()
    if "v6" in kind or "v7" in kind:   # bf16 VALU + bf16 EUP tanh available
        return jnp.bfloat16
    return jnp.float32                 # v5e has no bf16 VPU/EUP; unknown: stay f32


def _choose_s_chunk(s_pad):
    for c in (512, 256, 128):          # lane-aligned chunks, 256-512 preferred
        if s_pad % c == 0:
            return c
    return s_pad


def _choose_block_b(batch, s_pad, d, s_chunk, vmem_budget):
    """Largest tb (multiple of 8 when possible) whose tile fits the VMEM budget."""
    def fits(tb):
        enc = 2 * tb * s_pad * d * 4             # double-buffered f32 enc stream
        small = 2 * tb * (d + 3 * s_pad) * 4     # q + hist + mask + out (double buf)
        weights = 2 * (d * d * 2 + 2 * d * 4)    # W_enc bf16 + whis/vt (worst case 2x)
        scratch = tb * s_pad * 4                 # scores scratch
        temps = 4 * tb * s_chunk * d * 4         # k / his / all_v chunk temporaries
        return enc + small + weights + scratch + temps <= vmem_budget

    cands = [t for t in range(8 * (batch // 8), 0, -8) if batch % t == 0]
    for tb in cands:                             # prefer >=2 grid steps (v7x: 2 TCs)
        if batch // tb >= 2 and fits(tb):
            return tb
    for tb in cands:
        if fits(tb):
            return tb
    return batch                                 # tiny / awkward batches: one block


# ----------------------------------------------------------------------------
# pallas_call builder + public wrapper
# ----------------------------------------------------------------------------
def _build_call(B, S_pad, D, tb, s_chunk, compute_dtype, vmem_limit,
                single_buffer_weights):
    kernel = functools.partial(_qkv_attention2_kernel,
                               s_chunk=s_chunk, compute_dtype=compute_dtype)

    def wspec(shape):
        kwargs = {}
        if single_buffer_weights:
            kwargs["pipeline_mode"] = pl.Buffered(1)   # grid-invariant: 1 buffer
        return pl.BlockSpec(shape, lambda b: (0, 0), **kwargs)

    grid_spec = pltpu.PrefetchScalarGridSpec(
        num_scalar_prefetch=0,
        grid=(B // tb,),
        in_specs=[
            pl.BlockSpec((tb, D), lambda b: (b, 0)),            # Q (+bias), f32
            pl.BlockSpec((tb, S_pad, D), lambda b: (b, 0, 0)),  # enc_out, f32
            pl.BlockSpec((tb, S_pad), lambda b: (b, 0)),        # history
            pl.BlockSpec((tb, S_pad), lambda b: (b, 0)),        # mask
            wspec((D, D)),                                      # W_enc (bf16)
            wspec((1, D)),                                      # W_his
            wspec((1, D)),                                      # VT (row)
        ],
        out_specs=pl.BlockSpec((tb, S_pad), lambda b: (b, 0)),  # lane-dense output
        scratch_shapes=[pltpu.VMEM((tb, S_pad), jnp.float32)],  # scores scratch
    )
    return pl.pallas_call(
        kernel,
        out_shape=jax.ShapeDtypeStruct((B, S_pad), jnp.float32),
        grid_spec=grid_spec,
        compiler_params=pltpu.CompilerParams(
            dimension_semantics=("parallel",),
            vmem_limit_bytes=int(vmem_limit)),
    )


def qkv_attention2(dec_out, enc_out, enc_mask, history, params, *,
                   block_b=None, compute_dtype=None):
    """Pallas forward pass. Returns attn of shape [B, 1, S] (matches PyTorch)."""
    B, _, D = dec_out.shape
    S = enc_out.shape[1]
    S_pad = ((S + 127) // 128) * 128        # lane-align S: unmasked full-lane stores
    cd = compute_dtype if compute_dtype is not None else _elementwise_dtype()
    budget, vmem_limit = _vmem_budget_and_limit()
    s_chunk = _choose_s_chunk(S_pad)
    tb = block_b if block_b is not None else _choose_block_b(B, S_pad, D, s_chunk, budget)
    assert B % tb == 0, "block_b must divide the batch"
    assert tb % 8 == 0 or tb == B, "block_b must be a multiple of 8 or the full batch"

    f32 = jnp.float32
    # Hoist Q = dec @ W_dec + bias to one full-batch XLA GEMM (M=tb wastes the MXU).
    q = (jnp.dot(dec_out[:, 0, :].astype(f32), params["wd"].astype(f32))
         + params["bias"].astype(f32).reshape(1, D))                     # (B, D)
    enc = enc_out.astype(f32)                # bf16 cast happens inside the kernel
    hist = history.reshape(B, S).astype(f32)                 # squeeze size-1 dims
    mask = enc_mask.reshape(B, S).astype(jnp.int32)
    if S_pad != S:
        enc = jnp.pad(enc, ((0, 0), (0, S_pad - S), (0, 0)))
        hist = jnp.pad(hist, ((0, 0), (0, S_pad - S)))
        mask = jnp.pad(mask, ((0, 0), (0, S_pad - S)), constant_values=1)  # pad = masked
    we = params["we"].astype(jnp.bfloat16)
    whis = params["whis"].reshape(1, D).astype(f32)
    vt = params["vt"].reshape(1, D).astype(f32)

    args = (q, enc, hist, mask, we, whis, vt)
    try:
        # Preferred: single-buffered grid-invariant weights.
        out = jax.block_until_ready(
            _build_call(B, S_pad, D, tb, s_chunk, cd, vmem_limit, True)(*args))
    except Exception:
        # Fallback if this runtime rejects pipeline_mode=pl.Buffered(1).
        out = _build_call(B, S_pad, D, tb, s_chunk, cd, vmem_limit, False)(*args)
    return out[:, :S][:, None, :]            # [B, 1, S]


# ----------------------------------------------------------------------------
# Reference + demo
# ----------------------------------------------------------------------------
def _xavier_uniform(key, shape, fan_in, fan_out):
    bound = jnp.sqrt(6.0 / (fan_in + fan_out))
    return jax.random.uniform(key, shape, jnp.float32, -bound, bound)


def _reference(dec_out, enc_out, enc_mask, history, params, compute_dtype):
    """Plain-JAX mirror of the PyTorch forward (same dtype chain as the kernel)."""
    f32, bf16 = jnp.float32, jnp.bfloat16
    q = jnp.dot(dec_out[:, 0, :], params["wd"]) + params["bias"].reshape(1, -1)  # (B,D)
    k = jnp.einsum("bsd,de->bse", enc_out.astype(bf16), params["we"].astype(bf16),
                   preferred_element_type=f32)                                   # (B,S,D)
    his = history[:, 0, :, None] * params["whis"].reshape(1, 1, -1)              # (B,S,D)
    all_v = jnp.tanh(q[:, None, :].astype(compute_dtype)
                     + k.astype(compute_dtype) + his.astype(compute_dtype))
    scores = jnp.sum(all_v.astype(f32) * params["vt"].reshape(1, 1, -1), axis=-1)  # (B,S)
    scores = jnp.where(enc_mask[:, 0, :], -jnp.inf, scores)
    return jax.nn.softmax(scores, axis=-1)[:, None, :]                           # (B,1,S)


if __name__ == "__main__":
    B, S, D = 2, 8, 32   # batch, enc seq_len, enc_dim == dec_dim
    key = jax.random.PRNGKey(0)
    k_dec, k_enc, k_his, k_wd, k_we, k_wh, k_vt = jax.random.split(key, 7)

    dec_out = jax.random.normal(k_dec, (B, 1, D), jnp.float32)
    enc_out = jax.random.normal(k_enc, (B, S, D), jnp.float32)
    history = jax.random.uniform(k_his, (B, 1, S), jnp.float32)
    # mask out the tail of each sequence (True = masked); no fully-masked rows
    pos = jnp.arange(S)[None, None, :]
    enc_mask = pos >= jnp.array([S, S - 3])[:, None, None]           # [B, 1, S] bool

    # deterministic parameter init (xavier_uniform like the PyTorch module);
    # each param acts as the transposed nn.Linear weight (y = x @ W^T).
    params = {
        "wd": _xavier_uniform(k_wd, (D, D), D, D),      # W_dec^T
        "we": _xavier_uniform(k_we, (D, D), D, D),      # W_enc^T
        "whis": _xavier_uniform(k_wh, (1, D), 1, D),    # W_his^T
        "vt": _xavier_uniform(k_vt, (D, 1), D, 1),      # VT^T
        "bias": jnp.zeros((1, D), jnp.float32),
    }

    cd = _elementwise_dtype()
    attn = qkv_attention2(dec_out, enc_out, enc_mask, history, params,
                          compute_dtype=cd)
    attn = jax.block_until_ready(attn)

    ref = _reference(dec_out, enc_out, enc_mask, history, params, cd)
    tol = 1e-4 if jnp.dtype(cd) == jnp.float32 else 2e-2
    assert attn.shape == (B, 1, S)
    assert bool(jnp.all(jnp.isfinite(attn)))
    assert jnp.allclose(jnp.sum(attn, axis=-1), 1.0, atol=1e-5)
    assert jnp.allclose(attn, ref, atol=tol, rtol=tol), (
        "max abs err = %s" % jnp.max(jnp.abs(attn - ref)))
    print("KERNEL_OK")
</pallas_src>

<mosaic_0001>
module attributes {stable_mosaic.version = 11 : i64} {
  func.func @_qkv_attention2_kernel(%arg0: i32, %arg1: memref<2x32xf32, #tpu.memory_space<vmem>>, %arg2: memref<2x128x32xf32, #tpu.memory_space<vmem>>, %arg3: memref<2x128xf32, #tpu.memory_space<vmem>>, %arg4: memref<2x128xi32, #tpu.memory_space<vmem>>, %arg5: memref<32x32xbf16, #tpu.memory_space<vmem>>, %arg6: memref<1x32xf32, #tpu.memory_space<vmem>>, %arg7: memref<1x32xf32, #tpu.memory_space<vmem>>, %arg8: memref<2x128xf32, #tpu.memory_space<vmem>>, %arg9: memref<2x128xf32, #tpu.memory_space<vmem>>) attributes {dimension_semantics = [#tpu.dimension_semantics<parallel>], iteration_bounds = array<i64: 1>, scalar_prefetch = 0 : i64, scratch_operands = 1 : i64, tpu.core_type = #tpu.core_type<tc>, window_params = [{transform_indices = @transform_0, window_bounds = array<i64: 2, 32>}, {transform_indices = @transform_1, window_bounds = array<i64: 2, 128, 32>}, {transform_indices = @transform_2, window_bounds = array<i64: 2, 128>}, {transform_indices = @transform_3, window_bounds = array<i64: 2, 128>}, {pipeline_mode = #tpu.pipeline_mode<synchronous>, transform_indices = @transform_4, window_bounds = array<i64: 32, 32>}, {pipeline_mode = #tpu.pipeline_mode<synchronous>, transform_indices = @transform_5, window_bounds = array<i64: 1, 32>}, {pipeline_mode = #tpu.pipeline_mode<synchronous>, transform_indices = @transform_6, window_bounds = array<i64: 1, 32>}, {transform_indices = @transform_7, window_bounds = array<i64: 2, 128>}]} {
    %c0 = arith.constant 0 : index
    %c0_0 = arith.constant 0 : index
    %0 = vector.load %arg5[%c0, %c0_0] : memref<32x32xbf16, #tpu.memory_space<vmem>>, vector<32x32xbf16>
    %c0_1 = arith.constant 0 : index
    %c0_2 = arith.constant 0 : index
    %1 = vector.load %arg1[%c0_1, %c0_2] : memref<2x32xf32, #tpu.memory_space<vmem>>, vector<2x32xf32>
    %2 = vector.shape_cast %1 : vector<2x32xf32> to vector<2x1x32xf32>
    %c0_3 = arith.constant 0 : index
    %c0_4 = arith.constant 0 : index
    %3 = vector.load %arg6[%c0_3, %c0_4] : memref<1x32xf32, #tpu.memory_space<vmem>>, vector<1x32xf32>
    %4 = vector.shape_cast %3 : vector<1x32xf32> to vector<1x1x32xf32>
    %c0_5 = arith.constant 0 : index
    %c0_6 = arith.constant 0 : index
    %5 = vector.load %arg7[%c0_5, %c0_6] : memref<1x32xf32, #tpu.memory_space<vmem>>, vector<1x32xf32>
    %6 = vector.shape_cast %5 : vector<1x32xf32> to vector<1x1x32xf32>
    %c0_7 = arith.constant 0 : index
    %c0_8 = arith.constant 0 : index
    %c0_9 = arith.constant 0 : index
    %7 = vector.load %arg2[%c0_7, %c0_8, %c0_9] : memref<2x128x32xf32, #tpu.memory_space<vmem>>, vector<2x128x32xf32>
    %8 = arith.truncf %7 : vector<2x128x32xf32> to vector<2x128x32xbf16>
    %9 = vector.shape_cast %8 : vector<2x128x32xbf16> to vector<256x32xbf16>
    %cst = arith.constant dense<0.000000e+00> : vector<256x32xf32>
    %10 = tpu.matmul %9, %0, %cst {dimension_numbers = #tpu.dot_dimension_numbers<[1], [0], [0], [1], [0, 0, 1, 1], [], []>} : vector<256x32xbf16>, vector<32x32xbf16>, vector<256x32xf32> -> vector<256x32xf32>
    %11 = vector.shape_cast %10 : vector<256x32xf32> to vector<2x128x32xf32>
    %c0_10 = arith.constant 0 : index
    %c0_11 = arith.constant 0 : index
    %12 = vector.load %arg3[%c0_10, %c0_11] : memref<2x128xf32, #tpu.memory_space<vmem>>, vector<2x128xf32>
    %13 = vector.shape_cast %12 : vector<2x128xf32> to vector<2x128x1xf32>
    %14 = vector.broadcast %13 : vector<2x128x1xf32> to vector<2x128x32xf32>
    %15 = vector.broadcast %4 : vector<1x1x32xf32> to vector<2x128x32xf32>
    %16 = arith.mulf %14, %15 : vector<2x128x32xf32>
    %17 = vector.broadcast %2 : vector<2x1x32xf32> to vector<2x128x32xf32>
    %18 = arith.addf %17, %11 : vector<2x128x32xf32>
    %19 = arith.addf %18, %16 : vector<2x128x32xf32>
    %20 = math.tanh %19 : vector<2x128x32xf32>
    %21 = vector.broadcast %6 : vector<1x1x32xf32> to vector<2x128x32xf32>
    %22 = arith.mulf %20, %21 : vector<2x128x32xf32>
    %cst_12 = arith.constant dense<0.000000e+00> : vector<2x128xf32>
    %23 = vector.multi_reduction <add>, %22, %cst_12 [2] : vector<2x128x32xf32> to vector<2x128xf32>
    %c0_13 = arith.constant 0 : index
    %c0_14 = arith.constant 0 : index
    %24 = vector.load %arg9[%c0_13, %c0_14] : memref<2x128xf32, #tpu.memory_space<vmem>>, vector<2x128xf32>
    tpu.vector_store %arg9[%c0_13, %c0_14], %23 {strides = array<i32>} : memref<2x128xf32, #tpu.memory_space<vmem>>, vector<2x128xf32>,
    %c0_15 = arith.constant 0 : index
    %c0_16 = arith.constant 0 : index
    %25 = vector.load %arg4[%c0_15, %c0_16] : memref<2x128xi32, #tpu.memory_space<vmem>>, vector<2x128xi32>
    %c0_i32 = arith.constant 0 : i32
    %26 = vector.broadcast %c0_i32 : i32 to vector<2x128xi32>
    %27 = arith.cmpi ne, %25, %26 : vector<2x128xi32>
    %c0_17 = arith.constant 0 : index
    %c0_18 = arith.constant 0 : index
    %28 = vector.load %arg9[%c0_17, %c0_18] : memref<2x128xf32, #tpu.memory_space<vmem>>, vector<2x128xf32>
    %cst_19 = arith.constant 0xFF800000 : f32
    %29 = vector.broadcast %cst_19 : f32 to vector<2x128xf32>
    %30 = arith.select %27, %29, %28 : vector<2x128xi1>, vector<2x128xf32>
    %cst_20 = arith.constant dense<0xFF800000> : vector<2xf32>
    %31 = vector.multi_reduction <maximumf>, %30, %cst_20 [1] : vector<2x128xf32> to vector<2xf32>
    %32 = vector.shape_cast %31 : vector<2xf32> to vector<2x1xf32>
    %33 = vector.broadcast %32 : vector<2x1xf32> to vector<2x128xf32>
    %34 = arith.subf %30, %33 : vector<2x128xf32>
    %35 = math.exp %34 : vector<2x128xf32>
    %cst_21 = arith.constant dense<0.000000e+00> : vector<2xf32>
    %36 = vector.multi_reduction <add>, %35, %cst_21 [1] : vector<2x128xf32> to vector<2xf32>
    %37 = vector.shape_cast %36 : vector<2xf32> to vector<2x1xf32>
    %38 = vector.broadcast %37 : vector<2x1xf32> to vector<2x128xf32>
    %39 = arith.divf %35, %38 : vector<2x128xf32>
    %c0_22 = arith.constant 0 : index
    %c0_23 = arith.constant 0 : index
    %40 = vector.load %arg8[%c0_22, %c0_23] : memref<2x128xf32, #tpu.memory_space<vmem>>, vector<2x128xf32>
    tpu.vector_store %arg8[%c0_22, %c0_23], %39 {strides = array<i32>} : memref<2x128xf32, #tpu.memory_space<vmem>>, vector<2x128xf32>,
    return
  }
  func.func @transform_0(%arg0: i32) -> (i32, i32) {
    %c0_i32 = arith.constant 0 : i32
    %c0_i32_0 = arith.constant 0 : i32
    return %arg0, %c0_i32 : i32, i32
  }
  func.func @transform_1(%arg0: i32) -> (i32, i32, i32) {
    %c0_i32 = arith.constant 0 : i32
    %c0_i32_0 = arith.constant 0 : i32
    %c0_i32_1 = arith.constant 0 : i32
    return %arg0, %c0_i32, %c0_i32_0 : i32, i32, i32
  }
  func.func @transform_2(%arg0: i32) -> (i32, i32) {
    %c0_i32 = arith.constant 0 : i32
    %c0_i32_0 = arith.constant 0 : i32
    return %arg0, %c0_i32 : i32, i32
  }
  func.func @transform_3(%arg0: i32) -> (i32, i32) {
    %c0_i32 = arith.constant 0 : i32
    %c0_i32_0 = arith.constant 0 : i32
    return %arg0, %c0_i32 : i32, i32
  }
  func.func @transform_4(%arg0: i32) -> (i32, i32) {
    %c0_i32 = arith.constant 0 : i32
    %c0_i32_0 = arith.constant 0 : i32
    %c0_i32_1 = arith.constant 0 : i32
    return %c0_i32, %c0_i32_0 : i32, i32
  }
  func.func @transform_5(%arg0: i32) -> (i32, i32) {
    %c0_i32 = arith.constant 0 : i32
    %c0_i32_0 = arith.constant 0 : i32
    %c0_i32_1 = arith.constant 0 : i32
    return %c0_i32, %c0_i32_0 : i32, i32
  }
  func.func @transform_6(%arg0: i32) -> (i32, i32) {
    %c0_i32 = arith.constant 0 : i32
    %c0_i32_0 = arith.constant 0 : i32
    %c0_i32_1 = arith.constant 0 : i32
    return %c0_i32, %c0_i32_0 : i32, i32
  }
  func.func @transform_7(%arg0: i32) -> (i32, i32) {
    %c0_i32 = arith.constant 0 : i32
    %c0_i32_0 = arith.constant 0 : i32
    return %arg0, %c0_i32 : i32, i32
  }
}

module attributes {stable_mosaic.version = 11 : i64} {
  func.func @_qkv_attention2_kernel(%arg0: i32, %arg1: memref<2x32xf32, #tpu.memory_space<vmem>>, %arg2: memref<2x128x32xf32, #tpu.memory_space<vmem>>, %arg3: memref<2x128xf32, #tpu.memory_space<vmem>>, %arg4: memref<2x128xi32, #tpu.memory_space<vmem>>, %arg5: memref<32x32xbf16, #tpu.memory_space<vmem>>, %arg6: memref<1x32xf32, #tpu.memory_space<vmem>>, %arg7: memref<1x32xf32, #tpu.memory_space<vmem>>, %arg8: memref<2x128xf32, #tpu.memory_space<vmem>>, %arg9: memref<2x128xf32, #tpu.memory_space<vmem>>) attributes {dimension_semantics = [#tpu.dimension_semantics<parallel>], iteration_bounds = array<i64: 1>, scalar_prefetch = 0 : i64, scratch_operands = 1 : i64, tpu.core_type = #tpu.core_type<tc>, window_params = [{transform_indices = @transform_0, window_bounds = array<i64: 2, 32>}, {transform_indices = @transform_1, window_bounds = array<i64: 2, 128, 32>}, {transform_indices = @transform_2, window_bounds = array<i64: 2, 128>}, {transform_indices = @transform_3, window_bounds = array<i64: 2, 128>}, {pipeline_mode = #tpu.pipeline_mode<synchronous>, transform_indices = @transform_4, window_bounds = array<i64: 32, 32>}, {pipeline_mode = #tpu.pipeline_mode<synchronous>, transform_indices = @transform_5, window_bounds = array<i64: 1, 32>}, {pipeline_mode = #tpu.pipeline_mode<synchronous>, transform_indices = @transform_6, window_bounds = array<i64: 1, 32>}, {transform_indices = @transform_7, window_bounds = array<i64: 2, 128>}]} {
    %c0 = arith.constant 0 : index
    %c0_0 = arith.constant 0 : index
    %0 = vector.load %arg5[%c0, %c0_0] : memref<32x32xbf16, #tpu.memory_space<vmem>>, vector<32x32xbf16>
    %c0_1 = arith.constant 0 : index
    %c0_2 = arith.constant 0 : index
    %1 = vector.load %arg1[%c0_1, %c0_2] : memref<2x32xf32, #tpu.memory_space<vmem>>, vector<2x32xf32>
    %2 = vector.shape_cast %1 : vector<2x32xf32> to vector<2x1x32xf32>
    %c0_3 = arith.constant 0 : index
    %c0_4 = arith.constant 0 : index
    %3 = vector.load %arg6[%c0_3, %c0_4] : memref<1x32xf32, #tpu.memory_space<vmem>>, vector<1x32xf32>
    %4 = vector.shape_cast %3 : vector<1x32xf32> to vector<1x1x32xf32>
    %c0_5 = arith.constant 0 : index
    %c0_6 = arith.constant 0 : index
    %5 = vector.load %arg7[%c0_5, %c0_6] : memref<1x32xf32, #tpu.memory_space<vmem>>, vector<1x32xf32>
    %6 = vector.shape_cast %5 : vector<1x32xf32> to vector<1x1x32xf32>
    %c0_7 = arith.constant 0 : index
    %c0_8 = arith.constant 0 : index
    %c0_9 = arith.constant 0 : index
    %7 = vector.load %arg2[%c0_7, %c0_8, %c0_9] : memref<2x128x32xf32, #tpu.memory_space<vmem>>, vector<2x128x32xf32>
    %8 = arith.truncf %7 : vector<2x128x32xf32> to vector<2x128x32xbf16>
    %9 = vector.shape_cast %8 : vector<2x128x32xbf16> to vector<256x32xbf16>
    %cst = arith.constant dense<0.000000e+00> : vector<256x32xf32>
    %10 = tpu.matmul %9, %0, %cst {dimension_numbers = #tpu.dot_dimension_numbers<[1], [0], [0], [1], [0, 0, 1, 1], [], []>} : vector<256x32xbf16>, vector<32x32xbf16>, vector<256x32xf32> -> vector<256x32xf32>
    %11 = vector.shape_cast %10 : vector<256x32xf32> to vector<2x128x32xf32>
    %c0_10 = arith.constant 0 : index
    %c0_11 = arith.constant 0 : index
    %12 = vector.load %arg3[%c0_10, %c0_11] : memref<2x128xf32, #tpu.memory_space<vmem>>, vector<2x128xf32>
    %13 = vector.shape_cast %12 : vector<2x128xf32> to vector<2x128x1xf32>
    %14 = vector.broadcast %13 : vector<2x128x1xf32> to vector<2x128x32xf32>
    %15 = vector.broadcast %4 : vector<1x1x32xf32> to vector<2x128x32xf32>
    %16 = arith.mulf %14, %15 : vector<2x128x32xf32>
    %17 = vector.broadcast %2 : vector<2x1x32xf32> to vector<2x128x32xf32>
    %18 = arith.addf %17, %11 : vector<2x128x32xf32>
    %19 = arith.addf %18, %16 : vector<2x128x32xf32>
    %20 = math.tanh %19 : vector<2x128x32xf32>
    %21 = vector.broadcast %6 : vector<1x1x32xf32> to vector<2x128x32xf32>
    %22 = arith.mulf %20, %21 : vector<2x128x32xf32>
    %cst_12 = arith.constant dense<0.000000e+00> : vector<2x128xf32>
    %23 = vector.multi_reduction <add>, %22, %cst_12 [2] : vector<2x128x32xf32> to vector<2x128xf32>
    %c0_13 = arith.constant 0 : index
    %c0_14 = arith.constant 0 : index
    %24 = vector.load %arg9[%c0_13, %c0_14] : memref<2x128xf32, #tpu.memory_space<vmem>>, vector<2x128xf32>
    tpu.vector_store %arg9[%c0_13, %c0_14], %23 {strides = array<i32>} : memref<2x128xf32, #tpu.memory_space<vmem>>, vector<2x128xf32>,
    %c0_15 = arith.constant 0 : index
    %c0_16 = arith.constant 0 : index
    %25 = vector.load %arg4[%c0_15, %c0_16] : memref<2x128xi32, #tpu.memory_space<vmem>>, vector<2x128xi32>
    %c0_i32 = arith.constant 0 : i32
    %26 = vector.broadcast %c0_i32 : i32 to vector<2x128xi32>
    %27 = arith.cmpi ne, %25, %26 : vector<2x128xi32>
    %c0_17 = arith.constant 0 : index
    %c0_18 = arith.constant 0 : index
    %28 = vector.load %arg9[%c0_17, %c0_18] : memref<2x128xf32, #tpu.memory_space<vmem>>, vector<2x128xf32>
    %cst_19 = arith.constant 0xFF800000 : f32
    %29 = vector.broadcast %cst_19 : f32 to vector<2x128xf32>
    %30 = arith.select %27, %29, %28 : vector<2x128xi1>, vector<2x128xf32>
    %cst_20 = arith.constant dense<0xFF800000> : vector<2xf32>
    %31 = vector.multi_reduction <maximumf>, %30, %cst_20 [1] : vector<2x128xf32> to vector<2xf32>
    %32 = vector.shape_cast %31 : vector<2xf32> to vector<2x1xf32>
    %33 = vector.broadcast %32 : vector<2x1xf32> to vector<2x128xf32>
    %34 = arith.subf %30, %33 : vector<2x128xf32>
    %35 = math.exp %34 : vector<2x128xf32>
    %cst_21 = arith.constant dense<0.000000e+00> : vector<2xf32>
    %36 = vector.multi_reduction <add>, %35, %cst_21 [1] : vector<2x128xf32> to vector<2xf32>
    %37 = vector.shape_cast %36 : vector<2xf32> to vector<2x1xf32>
    %38 = vector.broadcast %37 : vector<2x1xf32> to vector<2x128xf32>
    %39 = arith.divf %35, %38 : vector<2x128xf32>
    %c0_22 = arith.constant 0 : index
    %c0_23 = arith.constant 0 : index
    %40 = vector.load %arg8[%c0_22, %c0_23] : memref<2x128xf32, #tpu.memory_space<vmem>>, vector<2x128xf32>
    tpu.vector_store %arg8[%c0_22, %c0_23], %39 {strides = array<i32>} : memref<2x128xf32, #tpu.memory_space<vmem>>, vector<2x128xf32>,
    return
  }
  func.func @transform_0(%arg0: i32) -> (i32, i32) {
    %c0_i32 = arith.constant 0 : i32
    %c0_i32_0 = arith.constant 0 : i32
    return %arg0, %c0_i32 : i32, i32
  }
  func.func @transform_1(%arg0: i32) -> (i32, i32, i32) {
    %c0_i32 = arith.constant 0 : i32
    %c0_i32_0 = arith.constant 0 : i32
    %c0_i32_1 = arith.constant 0 : i32
    return %arg0, %c0_i32, %c0_i32_0 : i32, i32, i32
  }
  func.func @transform_2(%arg0: i32) -> (i32, i32) {
    %c0_i32 = arith.constant 0 : i32
    %c0_i32_0 = arith.constant 0 : i32
    return %arg0, %c0_i32 : i32, i32
  }
  func.func @transform_3(%arg0: i32) -> (i32, i32) {
    %c0_i32 = arith.constant 0 : i32
    %c0_i32_0 = arith.constant 0 : i32
    return %arg0, %c0_i32 : i32, i32
  }
  func.func @transform_4(%arg0: i32) -> (i32, i32) {
    %c0_i32 = arith.constant 0 : i32
    %c0_i32_0 = arith.constant 0 : i32
    %c0_i32_1 = arith.constant 0 : i32
    return %c0_i32, %c0_i32_0 : i32, i32
  }
  func.func @transform_5(%arg0: i32) -> (i32, i32) {
    %c0_i32 = arith.constant 0 : i32
    %c0_i32_0 = arith.constant 0 : i32
    %c0_i32_1 = arith.constant 0 : i32
    return %c0_i32, %c0_i32_0 : i32, i32
  }
  func.func @transform_6(%arg0: i32) -> (i32, i32) {
    %c0_i32 = arith.constant 0 : i32
    %c0_i32_0 = arith.constant 0 : i32
    %c0_i32_1 = arith.constant 0 : i32
    return %c0_i32, %c0_i32_0 : i32, i32
  }
  func.func @transform_7(%arg0: i32) -> (i32, i32) {
    %c0_i32 = arith.constant 0 : i32
    %c0_i32_0 = arith.constant 0 : i32
    return %arg0, %c0_i32 : i32, i32
  }
}

</mosaic_0001>

<bundles_post_ra>
// kernel: tpu_custom_call.1
= control target key start
LH: loop header
LB: loop body
LE: loop exit
PB: predicated region body
PF: predicated region fallthrough
CT: control target
= control target key end

     0   :  { %12 = vsyncpa [#allocation4], 0  ;;  %s1939_s0 = inlined_call_operand.hbm [shape: f32[2,32], index: 0, kind: input, shape index: {}]   ;;  %s1940_s1 = inlined_call_operand.hbm [shape: f32[2,128,32], index: 1, kind: input, shape index: {}]   ;;  %s1941_s2 = inlined_call_operand.hbm [shape: f32[2,128], index: 2, kind: input, shape index: {}]   ;;  %s1942_s3 = inlined_call_operand.hbm [shape: s32[2,128], index: 3, kind: input, shape index: {}]   ;;  %s1943_s4 = inlined_call_operand.hbm [shape: bf16[32,32], index: 4, kind: input, shape index: {}]   ;;  %s1944_s5 = inlined_call_operand.hbm [shape: f32[1,32], index: 5, kind: input, shape index: {}]   ;;  %s1945_s6 = inlined_call_operand.hbm [shape: f32[1,32], index: 6, kind: input, shape index: {}]   ;;  %s1946_s7 = inlined_call_operand.hbm [shape: f32[2,128], index: 7, kind: output, shape index: {}]  }
   0x1   :  { %13 = vsyncpa [#allocation7], 0 }
   0x2   :  { %14 = vsyncpa [#allocation10], 0 }
   0x3   :  { %15 = vsyncpa [#allocation13], 0 }
   0x4   :  { %16 = vsyncpa [#allocation5], 0  ;;  %s1435_s24 = smov [#allocation6]   ;;  %s1249_s28 = scalar_lea.hbm %s1940_s1, 4096 }
   0x5   :  { %s32_s25 = sshll.u32 %s1435_s24, 4  ;;  %p1250_p0 = scmp.ne.s32.totalorder %s1940_s1, %s1249_s28  ;;  %s33_s25 = int_to_ptr.vmem [resolvable:$true] %s32_s25 }
   0x6   :  { %p1253_p1 = scmp.lt.u32.totalorder %s1249_s28, %s1940_s1 }
   0x8   :  { %p1255_p2 = pnand %p1253_p1, %p1250_p0 }
   0xa   :  { %1258 = shalt.err (!%p1255_p2)
}
   0xb   :  { %s1259_s10 = scalar_lea.vmem %s33_s25, 4096  ;;  %p1264_p4 = scmp.lt.s32.totalorder %s33_s25, %s33_s25 }
   0xc   :  { %p1260_p3 = scmp.ne.s32.totalorder %s33_s25, %s1259_s10  ;;  %p1265_p5 = scmp.lt.s32.totalorder %s1259_s10, %s1259_s10 }
   0xe   :  { %p1266_p6 = por %p1265_p5, %p1264_p4 }
  0x10   :  { %p1267_p7 = pnand %p1266_p6, %p1260_p3 }
  0x12   :  { %1270 = shalt.err (!%p1267_p7)
}
  0x13   :  { %s1436_s11 = smov 128   ;;  %s1437_s12 = smov 8  }
  0x14   :  { %38 = dma.hbm_to_vmem [thread:$0]  %s1940_s1, 4096, %s33_s25, [#allocation7], %s1436_s11, %s1436_s11, %s1437_s12  }
  0x15   :  { %s1438_s15 = smov [#allocation9]   ;;  %s1439_s17 = smov [#allocation12]  }
  0x16   :  { %s55_s16 = sshll.u32 %s1438_s15, 4  ;;  %s77_s18 = sshll.u32 %s1439_s17, 4  ;;  %s56_s16 = int_to_ptr.vmem [resolvable:$true] %s55_s16  ;;  %s78_s18 = int_to_ptr.vmem [resolvable:$true] %s77_s18 }
  0x17   :  { %s1271_s21 = scalar_lea.hbm %s1942_s3, 32 }
  0x18   :  { %p1272_p8 = scmp.ne.s32.totalorder %s1942_s3, %s1271_s21  ;;  %p1275_p9 = scmp.lt.u32.totalorder %s1271_s21, %s1942_s3 }
  0x1a   :  { %p1277_p10 = pnand %p1275_p9, %p1272_p8 }
  0x1c   :  { %1280 = shalt.err (!%p1277_p10)
}
  0x1d   :  { %s1281_s1 = scalar_lea.vmem %s56_s16, 32  ;;  %p1286_p12 = scmp.lt.s32.totalorder %s56_s16, %s56_s16 }
  0x1e   :  { %p1282_p11 = scmp.ne.s32.totalorder %s56_s16, %s1281_s1  ;;  %p1287_p13 = scmp.lt.s32.totalorder %s1281_s1, %s1281_s1 }
  0x20   :  { %p1288_p0 = por %p1287_p13, %p1286_p12 }
  0x22   :  { %p1289_p1 = pnand %p1288_p0, %p1282_p11 }
  0x24   :  { %1292 = shalt.err (!%p1289_p1)
}
  0x25   :  { %58 = dma.hbm_to_vmem [thread:$0]  %s1942_s3, 32, %s56_s16, [#allocation10]  }
  0x26   :  { %s1293_s30 = scalar_lea.hbm %s1944_s5, 16 }
  0x27   :  { %p1294_p2 = scmp.ne.s32.totalorder %s1944_s5, %s1293_s30  ;;  %p1297_p3 = scmp.lt.u32.totalorder %s1293_s30, %s1944_s5 }
  0x29   :  { %p1299_p4 = pnand %p1297_p3, %p1294_p2 }
  0x2b   :  { %1302 = shalt.err (!%p1299_p4)
}
  0x2c   :  { %s1303_s12 = scalar_lea.vmem %s78_s18, 16  ;;  %s1307_s13 = scalar_lea.vmem %s78_s18, 32 }
  0x2d   :  { %p1304_p5 = scmp.ne.s32.totalorder %s78_s18, %s1303_s12  ;;  %p1308_p6 = scmp.lt.s32.totalorder %s78_s18, %s78_s18 }
  0x2e   :  { %p1309_p7 = scmp.lt.s32.totalorder %s1307_s13, %s1303_s12 }
  0x30   :  { %p1310_p8 = por %p1309_p7, %p1308_p6 }
  0x32   :  { %p1311_p9 = pnand %p1310_p8, %p1304_p5 }
  0x34   :  { %1314 = shalt.err (!%p1311_p9)
}
  0x35   :  { %80 = dma.hbm_to_vmem [thread:$0]  %s1944_s5, 16, %s78_s18, [#allocation13]  }
  0x36   :  { %s1440_s15 = smov [#allocation3]   ;;  %s1441_s17 = smov [#allocation8]  }
  0x37   :  { %s23_s16 = sshll.u32 %s1440_s15, 4  ;;  %s45_s19 = sshll.u32 %s1441_s17, 4  ;;  %s24_s16 = int_to_ptr.vmem [resolvable:$true] %s23_s16  ;;  %s46_s19 = int_to_ptr.vmem [resolvable:$true] %s45_s19 }
  0x38   :  { %s1315_s22 = scalar_lea.hbm %s1939_s0, 32 }
  0x39   :  { %p1316_p10 = scmp.ne.s32.totalorder %s1939_s0, %s1315_s22  ;;  %p1319_p11 = scmp.lt.u32.totalorder %s1315_s22, %s1939_s0 }
  0x3b   :  { %p1321_p12 = pnand %p1319_p11, %p1316_p10 }
  0x3d   :  { %1324 = shalt.err (!%p1321_p12)
}
  0x3e   :  { %s1325_s5 = scalar_lea.vmem %s24_s16, 32  ;;  %p1330_p0 = scmp.lt.s32.totalorder %s24_s16, %s24_s16 }
  0x3f   :  { %p1326_p13 = scmp.ne.s32.totalorder %s24_s16, %s1325_s5  ;;  %p1331_p1 = scmp.lt.s32.totalorder %s1325_s5, %s1325_s5 }
  0x41   :  { %p1332_p2 = por %p1331_p1, %p1330_p0 }
  0x43   :  { %p1333_p3 = pnand %p1332_p2, %p1326_p13 }
  0x45   :  { %1336 = shalt.err (!%p1333_p3)
}
  0x46   :  { %26 = dma.hbm_to_vmem [thread:$0]  %s1939_s0, 32, %s24_s16, [#allocation4]  }
  0x47   :  { %s1337_s29 = scalar_lea.hbm %s1941_s2, 32 }
  0x48   :  { %p1338_p4 = scmp.ne.s32.totalorder %s1941_s2, %s1337_s29  ;;  %p1341_p5 = scmp.lt.u32.totalorder %s1337_s29, %s1941_s2 }
  0x4a   :  { %p1343_p6 = pnand %p1341_p5, %p1338_p4 }
  0x4c   :  { %1346 = shalt.err (!%p1343_p6)
}
  0x4d   :  { %s1347_s11 = scalar_lea.vmem %s46_s19, 32  ;;  %p1352_p8 = scmp.lt.s32.totalorder %s46_s19, %s46_s19 }
  0x4e   :  { %p1348_p7 = scmp.ne.s32.totalorder %s46_s19, %s1347_s11  ;;  %p1353_p9 = scmp.lt.s32.totalorder %s1347_s11, %s1347_s11 }
  0x50   :  { %p1354_p10 = por %p1353_p9, %p1352_p8 }
  0x52   :  { %p1355_p11 = pnand %p1354_p10, %p1348_p7 }
  0x54   :  { %1358 = shalt.err (!%p1355_p11)
}
  0x55   :  { %48 = dma.hbm_to_vmem [thread:$0]  %s1941_s2, 32, %s46_s19, [#allocation7]  }
  0x56   :  { %s1442_s13 = smov [#allocation11]   ;;  %s1359_s16 = scalar_lea.hbm %s1943_s4, 256 }
  0x57   :  { %s64_s3 = sshll.u32 %s1442_s13, 4  ;;  %p1360_p12 = scmp.ne.s32.totalorder %s1943_s4, %s1359_s16  ;;  %s65_s3 = int_to_ptr.vmem [resolvable:$true] %s64_s3 }
  0x58   :  { %p1363_p13 = scmp.lt.u32.totalorder %s1359_s16, %s1943_s4 }
  0x5a   :  { %p1365_p0 = pnand %p1363_p13, %p1360_p12 }
  0x5c   :  { %1368 = shalt.err (!%p1365_p0)
}
  0x5d   :  { %s1369_s23 = scalar_lea.vmem %s65_s3, 256  ;;  %p1374_p2 = scmp.lt.s32.totalorder %s65_s3, %s65_s3 }
  0x5e   :  { %p1370_p1 = scmp.ne.s32.totalorder %s65_s3, %s1369_s23  ;;  %p1375_p3 = scmp.lt.s32.totalorder %s1369_s23, %s1369_s23 }
  0x60   :  { %p1376_p4 = por %p1375_p3, %p1374_p2 }
  0x62   :  { %p1377_p5 = pnand %p1376_p4, %p1370_p1 }
  0x64   :  { %1380 = shalt.err (!%p1377_p5)
}
  0x65   :  { %s1443_s2 = smov 64   ;;  %s1444_s19 = smov 4  }
  0x66   :  { %70 = dma.hbm_to_vmem [thread:$0]  %s1943_s4, 256, %s65_s3, [#allocation10], %s1443_s2, %s1443_s2, %s1444_s19  }
  0x67   :  { %s1445_s1 = smov [#allocation14]   ;;  %s1381_s27 = scalar_lea.hbm %s1945_s6, 16 }
  0x68   :  { %s87_s5 = sshll.u32 %s1445_s1, 4  ;;  %p1382_p6 = scmp.ne.s32.totalorder %s1945_s6, %s1381_s27  ;;  %s88_s5 = int_to_ptr.vmem [resolvable:$true] %s87_s5 }
  0x69   :  { %p1385_p7 = scmp.lt.u32.totalorder %s1381_s27, %s1945_s6 }
  0x6b   :  { %p1387_p8 = pnand %p1385_p7, %p1382_p6 }
  0x6d   :  { %1390 = shalt.err (!%p1387_p8)
}
  0x6e   :  { %s1391_s9 = scalar_lea.vmem %s88_s5, 16  ;;  %s1395_s4 = scalar_lea.vmem %s88_s5, 32 }
  0x6f   :  { %p1392_p9 = scmp.ne.s32.totalorder %s88_s5, %s1391_s9  ;;  %p1396_p10 = scmp.lt.s32.totalorder %s88_s5, %s88_s5 }
  0x70   :  { %p1397_p11 = scmp.lt.s32.totalorder %s1395_s4, %s1391_s9 }
  0x72   :  { %p1398_p12 = por %p1397_p11, %p1396_p10 }
  0x74   :  { %p1399_p13 = pnand %p1398_p12, %p1392_p9 }
  0x76   :  { %1402 = shalt.err (!%p1399_p13)
}
  0x77   :  { %90 = dma.hbm_to_vmem [thread:$0]  %s1945_s6, 16, %s88_s5, [#allocation13]  }
  0x78   :  { %1425 = dma.done.wait [#allocation4], 32  }
  0x79   :  { %1426 = vsyncadd [#allocation4], 4294967264 }
  0x7a   :  { %1427 = dma.done.wait [#allocation7], 4128  }
  0x7b   :  { %1428 = vsyncadd [#allocation7], 4294963168 }
  0x7c   :  { %1429 = dma.done.wait [#allocation10], 288  }
  0x7d   :  { %1430 = vsyncadd [#allocation10], 4294967008 }
  0x7e   :  { %1431 = dma.done.wait [#allocation13], 32  }
  0x7f   :  { %1432 = vsyncadd [#allocation13], 4294967264  ;;  %v1179_v0 = vld [vmem:[#allocation11] sm:$0xff]   ;;  %v1180_v1 = vld [vmem:[#allocation11 + $0x8] sm:$0xff]   ;;  %v130_v2 = vlaneseq  ;;  %vm203_vm0 = vcmask 261120   ;;  %vm869_vm1 = vcmask 130112  }
  0x80   :  { %1126 = vmatprep.subr.bf16.mxu0 %v1179_v0  ;;  %1162 = vmatprep.subr.bf16.mxu1 %v1179_v0  ;;  %v143_v3 = vld [vmem:[#allocation6] sm:$0xff]  ;;  %v144_v4 = vld [vmem:[#allocation6 + $0x8] sm:$0xff]  ;;  %v145_v8 = vld [vmem:[#allocation6 + $0x10] sm:$0xff]  ;;  %vm876_vm2 = vcmask 195712   ;;  %vm883_vm3 = vcmask 261312   ;;  %vm890_vm4 = vcmask 326912  }
  0x81   :  { %v159_v5 = vld [vmem:[#allocation6 + $0x80] sm:$0xff]  ;;  %1127 = vmatpush3.bf16.msra.mxu0 %v1179_v0  ;;  %1164 = vmatpush3.bf16.msra.mxu1 %v1179_v0  ;;  %v175_v6 = vpack.c.bf16 %v144_v4, %v143_v3  ;;  %v160_v7 = vld [vmem:[#allocation6 + $0x88] sm:$0xff]  ;;  %v146_v9 = vld [vmem:[#allocation6 + $0x18] sm:$0xff]  ;;  %v1574_v17 = vshrl.u32 %v130_v2, 7  ;;  %vm897_vm5 = vcmask 392512   ;;  %vm904_vm6 = vcmask 458112  }
  0x82   :  { %1128 = vmatprep.subr.bf16.mxu0 %v1180_v1  ;;  %1163 = vmatprep.subr.bf16.mxu1 %v1180_v1  ;;  %v183_v10 = vpack.c.bf16 %v160_v7, %v159_v5  ;;  %v161_v11 = vld [vmem:[#allocation6 + $0x90] sm:$0xff]  ;;  %v162_v12 = vld [vmem:[#allocation6 + $0x98] sm:$0xff]  ;;  %v147_v13 = vld [vmem:[#allocation6 + $0x20] sm:$0xff]  ;;  %v176_v18 = vpack.c.bf16 %v146_v9, %v145_v8  ;;  %v1446_v9 = vmov 1966171168   ;;  %vm911_vm7 = vcmask 523712  }
  0x83   :  { %1130 = vmatprep.mubr.msk.bf16.mxu0 %vm203_vm0, %v175_v6  ;;  %v148_v14 = vld [vmem:[#allocation6 + $0x28] sm:$0xff]  ;;  %v163_v15 = vld [vmem:[#allocation6 + $0xa0] sm:$0xff]  ;;  %v184_v19 = vpack.c.bf16 %v162_v12, %v161_v11  ;;  %v1578_v22 = vsub.s32 0, %v1574_v17  ;;  %v483_v23 = vsub.s32 1, %v1574_v17  ;;  %v149_v24 = vld [vmem:[#allocation6 + $0x30] sm:$0xff]  ;;  %vm918_vm8 = vcmask 589312  }
  0x84   :  { %v164_v16 = vld [vmem:[#allocation6 + $0xa8] sm:$0xff]  ;;  %1146 = vmatprep.mubr.msk.bf16.mxu1 %vm203_vm0, %v183_v10  ;;  %v177_v20 = vpack.c.bf16 %v148_v14, %v147_v13  ;;  %v150_v25 = vld [vmem:[#allocation6 + $0x38] sm:$0xff]  ;;  %v165_v26 = vld [vmem:[#allocation6 + $0xb0] sm:$0xff]  ;;  %v128_v10 = vunpack.c.l.s4 %v1446_v9  ;;  %vm925_vm9 = vcmask 654912   ;;  %vm932_vm10 = vcmask 720512   ;;  %s1447_s6 = smov [#allocation15]  }
  0x85   :  { %1129 = vmatpush3.bf16.msra.mxu0 %v1180_v1  ;;  %1165 = vmatpush3.bf16.msra.mxu1 %v1180_v1  ;;  %v185_v21 = vpack.c.bf16 %v164_v16, %v163_v15  ;;  %v166_v27 = vld [vmem:[#allocation6 + $0xb8] sm:$0xff]  ;;  %v151_v28 = vld [vmem:[#allocation6 + $0x40] sm:$0xff]  ;;  %v152_v29 = vld [vmem:[#allocation6 + $0x48] sm:$0xff]  ;;  %v178_v35 = vpack.c.bf16 %v150_v25, %v149_v24  ;;  %vm939_vm11 = vcmask 786112   ;;  %vm946_vm12 = vcmask 851712   ;;  %s1075_s0 = sshll.u32 %s1447_s6, 4  ;;  %s1076_s0 = int_to_ptr.vmem [resolvable:$true] %s1075_s0 }
  0x86   :  { %v167_v30 = vld [vmem:[#allocation6 + $0xc0] sm:$0xff]  ;;  %v168_v31 = vld [vmem:[#allocation6 + $0xc8] sm:$0xff]  ;;  %v186_v36 = vpack.c.bf16 %v166_v27, %v165_v26  ;;  %v179_v37 = vpack.c.bf16 %v152_v29, %v151_v28  ;;  %v153_v39 = vld [vmem:[#allocation6 + $0x50] sm:$0xff]  ;;  %v129_v13 = vunpack.c.0.s8 %v128_v10  ;;  %vm953_vm13 = vcmask 917312   ;;  %s1403_s12 = scalar_lea.vmem %s1076_s0, 32  ;;  %p1408_p1 = scmp.lt.s32.totalorder %s1076_s0, %s1076_s0 }
  0x87   :  { %v413_v32 = vld [vmem:[#allocation8] sm:$0x3]  ;;  %v187_v38 = vpack.c.bf16 %v168_v31, %v167_v30  ;;  %v154_v40 = vld [vmem:[#allocation6 + $0x58] sm:$0xff]  ;;  %v169_v41 = vld [vmem:[#allocation6 + $0xd0] sm:$0xff]  ;;  %vm960_vm14 = vcmask 982912   ;;  %vm967_vm15 = vcmask 1048512   ;;  %p1404_p0 = scmp.ne.s32.totalorder %s1076_s0, %s1403_s12  ;;  %p1409_p2 = scmp.lt.s32.totalorder %s1403_s12, %s1403_s12 }
  0x88   :  { %1131 = vmatmul.mubr.msk.bf16.vlgmr.msra.gmra.mrb[0].mxu0 %vm203_vm0, %v176_v18  ;;  %1147 = vmatmul.mubr.msk.bf16.vlgmr.msra.gmra.mrb[0].mxu1 %vm203_vm0, %v184_v19  ;;  %v1586_v33 = vrot.slane %v413_v32, %v1578_v22  ;;  %v484_v34 = vrot.slane %v413_v32, %v483_v23  ;;  %v170_v42 = vld [vmem:[#allocation6 + $0xd8] sm:$0xff]  ;;  %v155_v43 = vld [vmem:[#allocation6 + $0x60] sm:$0xff]  ;;  %v156_v44 = vld [vmem:[#allocation6 + $0x68] sm:$0xff]  ;;  %v180_v47 = vpack.c.bf16 %v154_v40, %v153_v39 }
  0x89   :  { %1134 = vmatprep.mubr.msk.bf16.mxu0 %vm203_vm0, %v177_v20  ;;  %1150 = vmatprep.mubr.msk.bf16.mxu1 %vm203_vm0, %v185_v21  ;;  %v171_v45 = vld [vmem:[#allocation6 + $0xe0] sm:$0xff]  ;;  %v172_v46 = vld [vmem:[#allocation6 + $0xe8] sm:$0xff]  ;;  %v188_v48 = vpack.c.bf16 %v170_v42, %v169_v41  ;;  %v181_v49 = vpack.c.bf16 %v156_v44, %v155_v43  ;;  %v157_v51 = vld [vmem:[#allocation6 + $0x70] sm:$0xff]  ;;  %v132_v18 = vsub.s32 %v129_v13, %v1574_v17  ;;  %p1410_p3 = por %p1409_p2, %p1408_p1 }
  0x8a   :  { %419 = vbcast.lane.b32.xlu0 %v1586_v33, 256  ;;  %486 = vbcast.lane.b32.xlu1 %v484_v34, 256  ;;  %v189_v50 = vpack.c.bf16 %v172_v46, %v171_v45  ;;  %v158_v52 = vld [vmem:[#allocation6 + $0x78] sm:$0xff]  ;;  %v173_v53 = vld [vmem:[#allocation6 + $0xf0] sm:$0xff] }
  0x8b   :  { %v174_v54 = vld [vmem:[#allocation6 + $0xf8] sm:$0xff]  ;;  %v182_v55 = vpack.c.bf16 %v158_v52, %v157_v51  ;;  %v1645_v27 = vld [vmem:[#allocation12] ss:$0 sm:$0xff]  ;;  %p1411_p4 = pnand %p1410_p3, %p1404_p0 }
  0x8c   :  { %v190_v56 = vpack.c.bf16 %v174_v54, %v173_v53  ;;  %v1087_v14 = vld.sshfl [vmem:[#allocation3] sm:$0x11 pattern:$0x75316420] }
  0x8d   :  { %v126_v19 = vcombine.high %v1087_v14, %v1087_v14  ;;  %v133_v20 = vrot.slane %v1087_v14, %v132_v18 }
  0x8e   :  { %423 = vbcast.lane.b32.xlu0 %v1586_v33, 264  ;;  %490 = vbcast.lane.b32.xlu1 %v484_v34, 264 }
  0x8f   :  { %v140_v21 = vrot.slane %v126_v19, %v132_v18  ;;  %v1640_v25 = vrot.slane %v133_v20, %v1578_v22 }
  0x90   :  { %1135 = vmatmul.mubr.msk.bf16.gmra.mrb[4].mxu0 %vm203_vm0, %v178_v35  ;;  %1151 = vmatmul.mubr.msk.bf16.gmra.mrb[4].mxu1 %vm203_vm0, %v186_v36 }
  0x91   :  { %1138 = vmatprep.mubr.msk.bf16.mxu0 %vm203_vm0, %v179_v37  ;;  %1154 = vmatprep.mubr.msk.bf16.mxu1 %vm203_vm0, %v187_v38  ;;  %v1643_v26 = vrot.slane %v140_v21, %v1578_v22 }
  0x92   :  { %427 = vbcast.lane.b32.xlu0 %v1586_v33, 272  ;;  %494 = vbcast.lane.b32.xlu1 %v484_v34, 272 }
  0x96   :  { %431 = vbcast.lane.b32.xlu0 %v1586_v33, 280  ;;  %498 = vbcast.lane.b32.xlu1 %v484_v34, 280 }
  0x98   :  { %1139 = vmatmul.mubr.msk.bf16.gmra.mrb[8].mxu0 %vm203_vm0, %v180_v47  ;;  %1155 = vmatmul.mubr.msk.bf16.gmra.mrb[8].mxu1 %vm203_vm0, %v188_v48 }
  0x99   :  { %1142 = vmatprep.mubr.msk.bf16.mxu0 %vm203_vm0, %v181_v49  ;;  %1158 = vmatprep.mubr.msk.bf16.mxu1 %vm203_vm0, %v189_v50 }
  0x9a   :  { %435 = vbcast.lane.b32.xlu0 %v1586_v33, 288  ;;  %502 = vbcast.lane.b32.xlu1 %v484_v34, 288 }
  0x9e   :  { %439 = vbcast.lane.b32.xlu0 %v1586_v33, 296  ;;  %506 = vbcast.lane.b32.xlu1 %v484_v34, 296 }
  0xa0   :  { %1143 = vmatmul.mubr.msk.bf16.gmra.mrb[12].mxu0 %vm203_vm0, %v182_v55  ;;  %1159 = vmatmul.mubr.msk.bf16.gmra.mrb[12].mxu1 %vm203_vm0, %v190_v56 }
  0xa2   :  { %443 = vbcast.lane.b32.xlu0 %v1586_v33, 304  ;;  %510 = vbcast.lane.b32.xlu1 %v484_v34, 304 }
  0xa6   :  { %447 = vbcast.lane.b32.xlu0 %v1586_v33, 312  ;;  %514 = vbcast.lane.b32.xlu1 %v484_v34, 312 }
  0xaa   :  { %451 = vbcast.lane.b32.xlu0 %v1586_v33, 320  ;;  %518 = vbcast.lane.b32.xlu1 %v484_v34, 320 }
  0xae   :  { %455 = vbcast.lane.b32.xlu0 %v1586_v33, 328  ;;  %522 = vbcast.lane.b32.xlu1 %v484_v34, 328 }
  0xb2   :  { %459 = vbcast.lane.b32.xlu0 %v1586_v33, 336  ;;  %526 = vbcast.lane.b32.xlu1 %v484_v34, 336 }
  0xb6   :  { %463 = vbcast.lane.b32.xlu0 %v1586_v33, 344  ;;  %530 = vbcast.lane.b32.xlu1 %v484_v34, 344 }
  0xba   :  { %467 = vbcast.lane.b32.xlu0 %v1586_v33, 352  ;;  %534 = vbcast.lane.b32.xlu1 %v484_v34, 352 }
  0xbe   :  { %471 = vbcast.lane.b32.xlu0 %v1586_v33, 360  ;;  %538 = vbcast.lane.b32.xlu1 %v484_v34, 360 }
  0xc2   :  { %475 = vbcast.lane.b32.xlu0 %v1586_v33, 368  ;;  %542 = vbcast.lane.b32.xlu1 %v484_v34, 368 }
  0xc6   :  { %546 = vbcast.lane.b32.xlu1 %v484_v34, 376  ;;  %479 = vbcast.lane.b32.xlu0 %v1586_v33, 376 }
  0xfc   :  { %v487_v57 = vpop.permute.xlu1 %486  ;;  %v420_v58 = vpop.permute.xlu0 %419 }
  0xfd   :  { %v554_v38 = vmul.f32 %v1645_v27, %v420_v58  ;;  %v570_v48 = vmul.f32 %v1645_v27, %v487_v57 }
 0x100   :  { %v1614_v59 = vpop.permute.xlu1 %490  ;;  %v424_v60 = vpop.permute.xlu0 %423 }
 0x101   :  { %v555_v51 = vmul.f32 %v1645_v27, %v424_v60 }
 0x104   :  { %v495_v61 = vpop.permute.xlu1 %494  ;;  %v428_v62 = vpop.permute.xlu0 %427 }
 0x105   :  { %v556_v28 = vmul.f32 %v1645_v27, %v428_v62  ;;  %v572_v29 = vmul.f32 %v1645_v27, %v495_v61 }
 0x108   :  { %v499_v63 = vpop.permute.xlu1 %498  ;;  %v432_v0 = vpop.permute.xlu0 %431 }
 0x109   :  { %v557_v34 = vmul.f32 %v1645_v27, %v432_v0  ;;  %v573_v54 = vmul.f32 %v1645_v27, %v499_v63 }
 0x10c   :  { %v1616_v1 = vpop.permute.xlu1 %502  ;;  %v436_v3 = vpop.permute.xlu0 %435 }
 0x10d   :  { %v558_v60 = vmul.f32 %v1645_v27, %v436_v3 }
 0x110   :  { %v1618_v4 = vpop.permute.xlu1 %506  ;;  %v1620_v5 = vpop.permute.xlu0 %439 }
 0x114   :  { %v1622_v6 = vpop.permute.xlu1 %510  ;;  %v444_v7 = vpop.permute.xlu0 %443 }
 0x115   :  { %v560_v58 = vmul.f32 %v1645_v27, %v444_v7 }
 0x118   :  { %v1624_v8 = vpop.permute.xlu1 %514  ;;  %v1626_v11 = vpop.permute.xlu0 %447 }
 0x11c   :  { %v1628_v12 = vpop.permute.xlu1 %518  ;;  %v1630_v15 = vpop.permute.xlu0 %451 }
 0x120   :  { %v1632_v16 = vpop.permute.xlu1 %522  ;;  %v1635_v23 = vpop.permute.xlu0 %455 }
 0x124   :  { %v1637_v24 = vpop.permute.xlu1 %526  ;;  %v1649_v30 = vpop.permute.xlu0 %459 }
 0x128   :  { %v1651_v31 = vpop.permute.xlu1 %530  ;;  %v1666_v61 = vpop.permute.xlu0 %463 }
 0x12c   :  { %v1668_v57 = vpop.permute.xlu1 %534 }
 0x15b   :  { %v1132_v32 = vpop.f32.mrb[0].mxu0  ;;  %v1148_v33 = vpop.f32.mrb[0].mxu1 }
 0x15c   :  { %v598_v35 = vadd.f32 %v1132_v32, %v1640_v25  ;;  %v614_v36 = vadd.f32 %v1148_v33, %v1643_v26  ;;  %v286_v22 = vpop.f32.mrb[1].mxu0  ;;  %v350_v37 = vpop.f32.mrb[1].mxu1  ;;  %v571_v32 = vmul.f32 %v1645_v27, %v1614_v59  ;;  %v574_v59 = vmul.f32 %v1645_v27, %v1616_v1 }
 0x15d   :  { %v596_v39 = vadd.f32 %v1640_v25, %v286_v22  ;;  %v612_v40 = vadd.f32 %v1643_v26, %v350_v37  ;;  %v1133_v41 = vpop.f32.mrb[2].mxu0  ;;  %v1149_v42 = vpop.f32.mrb[2].mxu1 }
 0x15e   :  { %v630_v43 = vadd.f32 %v598_v35, %v556_v28  ;;  %v646_v44 = vadd.f32 %v614_v36, %v572_v29  ;;  %v599_v45 = vadd.f32 %v1133_v41, %v1640_v25  ;;  %v289_v46 = vpop.f32.mrb[3].mxu0  ;;  %v353_v47 = vpop.f32.mrb[3].mxu1  ;;  %v615_v55 = vadd.f32 %v1149_v42, %v1643_v26  ;;  %v1684_v36 = vld [vmem:[#allocation14] ss:$0 sm:$0xff] }
 0x15f   :  { %v628_v49 = vadd.f32 %v596_v39, %v554_v38  ;;  %v597_v50 = vadd.f32 %v1640_v25, %v289_v46  ;;  %v644_v53 = vadd.f32 %v612_v40, %v570_v48  ;;  %v613_v14 = vadd.f32 %v1643_v26, %v353_v47  ;;  %v1688_v39 = vpop.permute.xlu1 %538 }
 0x160   :  { %1181 = vtanh.f32 %v630_v43  ;;  %v631_v52 = vadd.f32 %v599_v45, %v557_v34  ;;  %v647_v63 = vadd.f32 %v615_v55, %v573_v54  ;;  %v561_v28 = vmul.f32 %v1645_v27, %v1626_v11  ;;  %v1686_v11 = vpop.permute.xlu0 %467 }
 0x161   :  { %1183 = vtanh.f32 %v646_v44  ;;  %v629_v56 = vadd.f32 %v597_v50, %v555_v51  ;;  %v576_v34 = vmul.f32 %v1645_v27, %v1622_v6  ;;  %v645_v22 = vadd.f32 %v613_v14, %v571_v32 }
 0x162   :  { %1185 = vtanh.f32 %v628_v49  ;;  %v559_v45 = vmul.f32 %v1645_v27, %v1620_v5  ;;  %v564_v51 = vmul.f32 %v1645_v27, %v1649_v30 }
 0x163   :  { %v1136_v62 = vpop.f32.mrb[4].mxu0  ;;  %v1152_v0 = vpop.f32.mrb[4].mxu1  ;;  %1187 = vtanh.f32 %v631_v52 }
 0x164   :  { %v602_v9 = vadd.f32 %v1136_v62, %v1640_v25  ;;  %v302_v10 = vpop.f32.mrb[5].mxu0  ;;  %v366_v13 = vpop.f32.mrb[5].mxu1  ;;  %1189 = vtanh.f32 %v644_v53  ;;  %v618_v33 = vadd.f32 %v1152_v0, %v1643_v26 }
 0x165   :  { %v600_v18 = vadd.f32 %v1640_v25, %v302_v10  ;;  %v1137_v7 = vpop.f32.mrb[6].mxu0  ;;  %v1153_v19 = vpop.f32.mrb[6].mxu1  ;;  %1191 = vtanh.f32 %v629_v56  ;;  %v616_v1 = vadd.f32 %v1643_v26, %v366_v13  ;;  %v577_v10 = vmul.f32 %v1645_v27, %v1624_v8 }
 0x166   :  { %v634_v20 = vadd.f32 %v602_v9, %v560_v58  ;;  %v603_v21 = vadd.f32 %v1137_v7, %v1640_v25  ;;  %v305_v3 = vpop.f32.mrb[7].mxu0  ;;  %v1677_v29 = vpop.f32.mrb[7].mxu1  ;;  %v650_v41 = vadd.f32 %v618_v33, %v576_v34  ;;  %v575_v8 = vmul.f32 %v1645_v27, %v1618_v4 }
 0x167   :  { %v632_v35 = vadd.f32 %v600_v18, %v558_v60  ;;  %v601_v46 = vadd.f32 %v1640_v25, %v305_v3  ;;  %v648_v13 = vadd.f32 %v616_v1, %v574_v59  ;;  %v1722_v3 = vpop.permute.xlu0 %471  ;;  %v1724_v32 = vpop.permute.xlu1 %542  ;;  %v617_v4 = vadd.f32 %v1643_v26, %v1677_v29 }
 0x168   :  { %1193 = vtanh.f32 %v634_v20  ;;  %v635_v38 = vadd.f32 %v603_v21, %v561_v28 }
 0x169   :  { %1195 = vtanh.f32 %v647_v63  ;;  %v633_v9 = vadd.f32 %v601_v46, %v559_v45  ;;  %v619_v63 = vadd.f32 %v1153_v19, %v1643_v26 }
 0x16a   :  { %v1182_v37 = vpop.eup %1181  ;;  %1197 = vtanh.f32 %v632_v35 }
 0x16b   :  { %v1184_v40 = vpop.eup %1183  ;;  %v700_v42 = vmul.f32 %v1182_v37, %v1684_v36  ;;  %v1693_v6 = vpop.f32.mrb[8].mxu1  ;;  %1199 = vtanh.f32 %v645_v22  ;;  %v562_v22 = vmul.f32 %v1645_v27, %v1630_v15 }
 0x16c   :  { %v1140_v43 = vpop.f32.mrb[8].mxu0  ;;  %v1186_v44 = vpop.eup %1185  ;;  %v716_v47 = vmul.f32 %v1184_v40, %v1684_v36  ;;  %1201 = vtanh.f32 %v635_v38  ;;  %v565_v38 = vmul.f32 %v1645_v27, %v1666_v61  ;;  %v622_v1 = vadd.f32 %v1693_v6, %v1643_v26 }
 0x16d   :  { %v318_v48 = vpop.f32.mrb[9].mxu0  ;;  %v1699_v49 = vpop.f32.mrb[9].mxu1  ;;  %v736_v50 = vsel %vm203_vm0, %v700_v42, 0.0  ;;  %v698_v55 = vmul.f32 %v1186_v44, %v1684_v36  ;;  %v606_v56 = vadd.f32 %v1140_v43, %v1640_v25  ;;  %1203 = vtanh.f32 %v650_v41 }
 0x16e   :  { %v1705_v52 = vpop.f32.mrb[10].mxu1  ;;  %v1141_v53 = vpop.f32.mrb[10].mxu0  ;;  %v784_v54 = vsel %vm203_vm0, %v716_v47, 0.0  ;;  %737 = vadd.xlane.f32.xlu1 %v736_v50  ;;  %1205 = vtanh.f32 %v633_v9  ;;  %v604_v37 = vadd.f32 %v1640_v25, %v318_v48  ;;  %v651_v41 = vadd.f32 %v619_v63, %v577_v10 }
 0x16f   :  { %v1188_v5 = vpop.eup %1187  ;;  %v1710_v58 = vpop.f32.mrb[11].mxu0  ;;  %785 = vadd.xlane.f32.xlu0 %v784_v54  ;;  %v730_v20 = vsel %vm203_vm0, %v698_v55, 0.0  ;;  %v638_v28 = vadd.f32 %v606_v56, %v564_v51  ;;  %1207 = vtanh.f32 %v648_v13  ;;  %v607_v46 = vadd.f32 %v1141_v53, %v1640_v25 }
 0x170   :  { %v1712_v62 = vpop.f32.mrb[11].mxu1  ;;  %v1190_v0 = vpop.eup %1189  ;;  %v701_v30 = vmul.f32 %v1188_v5, %v1684_v36  ;;  %v580_v51 = vmul.f32 %v1645_v27, %v1637_v24  ;;  %v636_v54 = vadd.f32 %v604_v37, %v562_v22 }
 0x171   :  { %v1192_v60 = vpop.eup %1191  ;;  %v714_v21 = vmul.f32 %v1190_v0, %v1684_v36  ;;  %1209 = vtanh.f32 %v638_v28  ;;  %v547_v55 = vpop.permute.xlu1 %546  ;;  %v649_v0 = vadd.f32 %v617_v4, %v575_v8 }
 0x172   :  { %v739_v14 = vsel %vm203_vm0, %v701_v30, 0.0  ;;  %v699_v18 = vmul.f32 %v1192_v60, %v1684_v36  ;;  %v1194_v7 = vpop.eup %1193  ;;  %1211 = vtanh.f32 %v651_v41  ;;  %v639_v60 = vadd.f32 %v607_v46, %v565_v38  ;;  %v476_v13 = vpop.permute.xlu0 %475 }
 0x173   :  { %740 = vadd.xlane.f32.xlu1 %v739_v14  ;;  %v1196_v33 = vpop.eup %1195  ;;  %731 = vadd.xlane.f32.xlu0 %v730_v20  ;;  %v704_v19 = vmul.f32 %v1194_v7, %v1684_v36  ;;  %v1729_v34 = vpop.f32.mrb[12].mxu1  ;;  %v778_v45 = vsel %vm203_vm0, %v714_v21, 0.0  ;;  %v654_v10 = vadd.f32 %v622_v1, %v580_v51  ;;  %v585_v63 = vmul.f32 %v1645_v27, %v547_v55 }
 0x174   :  { %v1144_v35 = vpop.f32.mrb[12].mxu0  ;;  %v1738_v59 = vpop.f32.mrb[13].mxu1  ;;  %v733_v42 = vsel %vm203_vm0, %v699_v18, 0.0  ;;  %v717_v61 = vmul.f32 %v1196_v33, %v1684_v36  ;;  %v563_v14 = vmul.f32 %v1645_v27, %v1635_v23  ;;  %1213 = vtanh.f32 %v636_v54 }
 0x175   :  { %v1736_v40 = vpop.f32.mrb[13].mxu0  ;;  %v1161_v43 = vpop.f32.mrb[14].mxu1  ;;  %v748_v50 = vsel %vm203_vm0, %v704_v19, 0.0  ;;  %v605_v18 = vadd.f32 %v1640_v25, %v1710_v58  ;;  %1215 = vtanh.f32 %v649_v0  ;;  %v578_v20 = vmul.f32 %v1645_v27, %v1628_v12 }
 0x176   :  { %v1743_v44 = vpop.f32.mrb[14].mxu0  ;;  %v1198_v15 = vpop.eup %1197  ;;  %v787_v30 = vsel %vm203_vm0, %v717_v61, 0.0  ;;  %v627_v9 = vadd.f32 %v1161_v43, %v1643_v26  ;;  %v620_v21 = vadd.f32 %v1643_v26, %v1699_v49  ;;  %1217 = vtanh.f32 %v639_v60 }
 0x177   :  { %734 = vadd.xlane.f32.xlu1 %v733_v42  ;;  %v1748_v47 = vpop.f32.mrb[15].mxu0  ;;  %v1750_v48 = vpop.f32.mrb[15].mxu1  ;;  %779 = vadd.xlane.f32.xlu0 %v778_v45  ;;  %v702_v53 = vmul.f32 %v1198_v15, %v1684_v36  ;;  %v610_v23 = vadd.f32 %v1144_v35, %v1640_v25  ;;  %v568_v58 = vmul.f32 %v1645_v27, %v476_v13  ;;  %1219 = vtanh.f32 %v654_v10 }
 0x178   :  { %v1200_v29 = vpop.eup %1199  ;;  %v659_v12 = vadd.f32 %v627_v9, %v585_v63  ;;  %v637_v38 = vadd.f32 %v605_v18, %v563_v14  ;;  %v652_v4 = vadd.f32 %v620_v21, %v578_v20  ;;  %v623_v41 = vadd.f32 %v1705_v52, %v1643_v26 }
 0x179   :  { %v1202_v5 = vpop.eup %1201  ;;  %v715_v6 = vmul.f32 %v1200_v29, %v1684_v36  ;;  %v742_v28 = vsel %vm203_vm0, %v702_v53, 0.0  ;;  %v581_v42 = vmul.f32 %v1645_v27, %v1651_v31  ;;  %v642_v15 = vadd.f32 %v610_v23, %v568_v58 }
 0x17a   :  { %v1204_v56 = vpop.eup %1203  ;;  %v705_v24 = vmul.f32 %v1202_v5, %v1684_v36  ;;  %1221 = vtanh.f32 %v659_v12  ;;  %v579_v46 = vmul.f32 %v1645_v27, %v1632_v16  ;;  %v566_v52 = vmul.f32 %v1645_v27, %v1686_v11 }
 0x17b   :  { %749 = vadd.xlane.f32.xlu1 %v748_v50  ;;  %788 = vadd.xlane.f32.xlu0 %v787_v30  ;;  %v720_v7 = vmul.f32 %v1204_v56, %v1684_v36  ;;  %v1206_v33 = vpop.eup %1205  ;;  %v781_v8 = vsel %vm203_vm0, %v715_v6, 0.0  ;;  %1223 = vtanh.f32 %v637_v38  ;;  %v608_v31 = vadd.f32 %v1640_v25, %v1736_v40  ;;  %v480_v30 = vpop.permute.xlu0 %479 }
 0x17c   :  { %v1208_v19 = vpop.eup %1207  ;;  %v751_v22 = vsel %vm203_vm0, %v705_v24, 0.0  ;;  %v703_v35 = vmul.f32 %v1206_v33, %v1684_v36  ;;  %1225 = vtanh.f32 %v652_v4  ;;  %v621_v29 = vadd.f32 %v1643_v26, %v1712_v62 }
 0x17d   :  { %v1210_v37 = vpop.eup %1209  ;;  %v796_v49 = vsel %vm203_vm0, %v720_v7, 0.0  ;;  %v718_v43 = vmul.f32 %v1208_v19, %v1684_v36  ;;  %v655_v1 = vadd.f32 %v623_v41, %v581_v42  ;;  %1227 = vtanh.f32 %v642_v15 }
 0x17e   :  { %v1212_v45 = vpop.eup %1211  ;;  %v708_v61 = vmul.f32 %v1210_v37, %v1684_v36  ;;  %v745_v50 = vsel %vm203_vm0, %v703_v35, 0.0  ;;  %v626_v11 = vadd.f32 %v1729_v34, %v1643_v26  ;;  %v584_v62 = vmul.f32 %v1645_v27, %v1724_v32 }
 0x17f   :  { %743 = vadd.xlane.f32.xlu1 %v742_v28  ;;  %782 = vadd.xlane.f32.xlu0 %v781_v8  ;;  %v1214_v51 = vpop.eup %1213  ;;  %v790_v5 = vsel %vm203_vm0, %v718_v43, 0.0  ;;  %v721_v16 = vmul.f32 %v1212_v45, %v1684_v36  ;;  %v567_v56 = vmul.f32 %v1645_v27, %v1722_v3  ;;  %v640_v0 = vadd.f32 %v608_v31, %v566_v52 }
 0x180   :  { %v1216_v54 = vpop.eup %1215  ;;  %v760_v40 = vsel %vm203_vm0, %v708_v61, 0.0  ;;  %v609_v53 = vadd.f32 %v1640_v25, %v1748_v47  ;;  %v653_v6 = vadd.f32 %v621_v29, %v579_v46  ;;  %1229 = vtanh.f32 %v655_v1 }
 0x181   :  { %v1218_v55 = vpop.eup %1217  ;;  %v706_v34 = vmul.f32 %v1214_v51, %v1684_v36  ;;  %v799_v9 = vsel %vm203_vm0, %v721_v16, 0.0  ;;  %v719_v10 = vmul.f32 %v1216_v54, %v1684_v36  ;;  %v658_v32 = vadd.f32 %v626_v11, %v584_v62 }
 0x182   :  { %v1220_v60 = vpop.eup %1219  ;;  %v569_v24 = vmul.f32 %v1645_v27, %v480_v30  ;;  %v709_v3 = vmul.f32 %v1218_v55, %v1684_v36  ;;  %1231 = vtanh.f32 %v640_v0  ;;  %v611_v47 = vadd.f32 %v1743_v44, %v1640_v25 }
 0x183   :  { %752 = vadd.xlane.f32.xlu1 %v751_v22  ;;  %797 = vadd.xlane.f32.xlu0 %v796_v49  ;;  %v641_v13 = vadd.f32 %v609_v53, %v567_v56  ;;  %v724_v63 = vmul.f32 %v1220_v60, %v1684_v36  ;;  %1233 = vtanh.f32 %v653_v6  ;;  %v582_v18 = vmul.f32 %v1645_v27, %v1668_v57 }
 0x184   :  { %v1222_v14 = vpop.eup %1221  ;;  %v624_v7 = vadd.f32 %v1643_v26, %v1738_v59  ;;  %v754_v20 = vsel %vm203_vm0, %v706_v34, 0.0  ;;  %v793_v28 = vsel %vm203_vm0, %v719_v10, 0.0  ;;  %1235 = vtanh.f32 %v658_v32 }
 0x185   :  { %v1224_v21 = vpop.eup %1223  ;;  %v729_v33 = vmul.f32 %v1222_v14, %v1684_v36  ;;  %v763_v44 = vsel %vm203_vm0, %v709_v3, 0.0  ;;  %1237 = vtanh.f32 %v641_v13  ;;  %v643_v23 = vadd.f32 %v611_v47, %v569_v24 }
 0x186   :  { %v1226_v25 = vpop.eup %1225  ;;  %v808_v57 = vsel %vm203_vm0, %v724_v63, 0.0  ;;  %v583_v59 = vmul.f32 %v1645_v27, %v1688_v39  ;;  %v656_v58 = vadd.f32 %v624_v7, %v582_v18  ;;  %v625_v19 = vadd.f32 %v1643_v26, %v1750_v48 }
 0x187   :  { %746 = vadd.xlane.f32.xlu1 %v745_v50  ;;  %791 = vadd.xlane.f32.xlu0 %v790_v5  ;;  %v1228_v8 = vpop.eup %1227  ;;  %v707_v22 = vmul.f32 %v1224_v21, %v1684_v36  ;;  %v722_v12 = vmul.f32 %v1226_v25, %v1684_v36  ;;  %1239 = vtanh.f32 %v643_v23  ;;  %v823_v56 = vsel %vm203_vm0, %v729_v33, 0.0 }
 0x188   :  { %v712_v38 = vmul.f32 %v1228_v8, %v1684_v36  ;;  %1241 = vtanh.f32 %v656_v58  ;;  %v657_v49 = vadd.f32 %v625_v19, %v583_v59  ;;  %v1856_v63 = vand.u32 127, %v130_v2 }
 0x189   :  { %v757_v4 = vsel %vm203_vm0, %v707_v22, 0.0  ;;  %v802_v27 = vsel %vm203_vm0, %v722_v12, 0.0 }
 0x18a   :  { %v1230_v37 = vpop.eup %1229  ;;  %v772_v48 = vsel %vm203_vm0, %v712_v38, 0.0  ;;  %1243 = vtanh.f32 %v657_v49  ;;  %v864_v14 = vadd.s32 4294967288, %v1856_v63  ;;  %v862_v25 = vsub.s32 %v1856_v63, %v1574_v17 }
 0x18b   :  { %761 = vadd.xlane.f32.xlu1 %v760_v40  ;;  %800 = vadd.xlane.f32.xlu0 %v799_v9  ;;  %v725_v26 = vmul.f32 %v1230_v37, %v1684_v36  ;;  %v885_v2 = vadd.s32 4294967264, %v1856_v63 }
 0x18c   :  { %v1232_v41 = vpop.eup %1231 }
 0x18d   :  { %v1234_v39 = vpop.eup %1233  ;;  %v710_v35 = vmul.f32 %v1232_v41, %v1684_v36  ;;  %v811_v15 = vsel %vm203_vm0, %v725_v26, 0.0  ;;  %v888_v38 = vsub.s32 %v885_v2, %v1574_v17 }
 0x18e   :  { %v1236_v42 = vpop.eup %1235  ;;  %v723_v45 = vmul.f32 %v1234_v39, %v1684_v36 }
 0x18f   :  { %755 = vadd.xlane.f32.xlu1 %v754_v20  ;;  %794 = vadd.xlane.f32.xlu0 %v793_v28  ;;  %v1238_v43 = vpop.eup %1237  ;;  %v728_v61 = vmul.f32 %v1236_v42, %v1684_v36  ;;  %v766_v46 = vsel %vm203_vm0, %v710_v35, 0.0  ;;  %v867_v20 = vsub.s32 %v864_v14, %v1574_v17  ;;  %v871_v28 = vadd.s32 4294967280, %v1856_v63 }
 0x190   :  { %v711_v52 = vmul.f32 %v1238_v43, %v1684_v36  ;;  %v805_v29 = vsel %vm203_vm0, %v723_v45, 0.0  ;;  %v906_v35 = vadd.s32 4294967240, %v1856_v63  ;;  %v913_v43 = vadd.s32 4294967232, %v1856_v63 }
 0x191   :  { %v1240_v31 = vpop.eup %1239  ;;  %v820_v50 = vsel %vm203_vm0, %v728_v61, 0.0  ;;  %v874_v58 = vsub.s32 %v871_v28, %v1574_v17 }
 0x192   :  { %v1242_v1 = vpop.eup %1241  ;;  %v769_v51 = vsel %vm203_vm0, %v711_v52, 0.0  ;;  %v713_v5 = vmul.f32 %v1240_v31, %v1684_v36 }
 0x193   :  { %764 = vadd.xlane.f32.xlu1 %v763_v44  ;;  %809 = vadd.xlane.f32.xlu0 %v808_v57  ;;  %v726_v16 = vmul.f32 %v1242_v1, %v1684_v36  ;;  %v878_v44 = vadd.s32 4294967272, %v1856_v63  ;;  %v892_v57 = vadd.s32 4294967256, %v1856_v63 }
 0x194   :  { %v1244_v54 = vpop.eup %1243  ;;  %v775_v11 = vsel %vm203_vm0, %v713_v5, 0.0 }
 0x195   :  { %v814_v40 = vsel %vm203_vm0, %v726_v16, 0.0  ;;  %v727_v62 = vmul.f32 %v1244_v54, %v1684_v36  ;;  %v881_v37 = vsub.s32 %v878_v44, %v1574_v17  ;;  %v895_v41 = vsub.s32 %v892_v57, %v1574_v17 }
 0x197   :  { %758 = vadd.xlane.f32.xlu1 %v757_v4  ;;  %803 = vadd.xlane.f32.xlu0 %v802_v27  ;;  %v817_v55 = vsel %vm203_vm0, %v727_v62, 0.0  ;;  %v909_v62 = vsub.s32 %v906_v35, %v1574_v17  ;;  %vm1048_vm0 = vcmask 1041409  }
 0x19b   :  { %773 = vadd.xlane.f32.xlu1 %v772_v48  ;;  %812 = vadd.xlane.f32.xlu0 %v811_v15  ;;  %v899_v48 = vadd.s32 4294967248, %v1856_v63  ;;  %v920_v15 = vadd.s32 4294967224, %v1856_v63 }
 0x19d   :  { %v902_v5 = vsub.s32 %v899_v48, %v1574_v17 }
 0x19f   :  { %767 = vadd.xlane.f32.xlu1 %v766_v46  ;;  %806 = vadd.xlane.f32.xlu0 %v805_v29 }
 0x1a3   :  { %770 = vadd.xlane.f32.xlu1 %v769_v51  ;;  %821 = vadd.xlane.f32.xlu0 %v820_v50 }
 0x1a7   :  { %776 = vadd.xlane.f32.xlu1 %v775_v11  ;;  %815 = vadd.xlane.f32.xlu0 %v814_v40 }
 0x1ab   :  { %818 = vadd.xlane.f32.xlu0 %v817_v55 }
 0x1af   :  { %824 = vadd.xlane.f32.xlu0 %v823_v56  ;;  %v916_v56 = vsub.s32 %v913_v43, %v1574_v17 }
 0x1fb   :  { %v738_v0 = vpop.xlane.xlu1 %737 }
 0x1fc   :  { %v786_v53 = vpop.xlane.xlu0 %785  ;;  %v875_v39 = vrot.slane %v738_v0, %v874_v58 }
 0x1fd   :  { %v981_v26 = vrot.slane %v786_v53, %v874_v58 }
 0x200   :  { %v741_v30 = vpop.xlane.xlu1 %740  ;;  %v732_v60 = vpop.xlane.xlu0 %731 }
 0x201   :  { %v863_v22 = vrot.slane %v732_v60, %v862_v25  ;;  %v882_v31 = vrot.slane %v741_v30, %v881_v37  ;;  %v923_v30 = vsub.s32 %v920_v15, %v1574_v17 }
 0x204   :  { %v735_v6 = vpop.xlane.xlu1 %734  ;;  %v780_v34 = vpop.xlane.xlu0 %779 }
 0x205   :  { %v868_v8 = vrot.slane %v735_v6, %v867_v20  ;;  %v972_v12 = vrot.slane %v780_v34, %v862_v25  ;;  %v927_v34 = vadd.s32 4294967216, %v1856_v63 }
 0x207   :  { %v870_v49 = vsel %vm869_vm1, %v868_v8, %v863_v22  ;;  %v930_v2 = vsub.s32 %v927_v34, %v1574_v17 }
 0x208   :  { %v1849_v9 = vpop.xlane.xlu1 %749  ;;  %v789_v10 = vpop.xlane.xlu0 %788  ;;  %v877_v45 = vsel %vm876_vm2, %v875_v39, %v870_v49 }
 0x209   :  { %v986_v29 = vrot.slane %v789_v10, %v881_v37  ;;  %v884_v54 = vsel %vm883_vm3, %v882_v31, %v877_v45  ;;  %v903_v60 = vrot.slane %v1849_v9, %v902_v5 }
 0x20c   :  { %v744_v32 = vpop.xlane.xlu1 %743  ;;  %v783_v24 = vpop.xlane.xlu0 %782 }
 0x20d   :  { %v976_v23 = vrot.slane %v783_v24, %v867_v20  ;;  %v889_v46 = vrot.slane %v744_v32, %v888_v38  ;;  %v934_v24 = vadd.s32 4294967208, %v1856_v63 }
 0x20f   :  { %v977_v4 = vsel %vm869_vm1, %v976_v23, %v972_v12  ;;  %v891_v40 = vsel %vm890_vm4, %v889_v46, %v884_v54  ;;  %v937_v57 = vsub.s32 %v934_v24, %v1574_v17 }
 0x210   :  { %v1851_v3 = vpop.xlane.xlu1 %752  ;;  %v1853_v36 = vpop.xlane.xlu0 %797  ;;  %v982_v61 = vsel %vm876_vm2, %v981_v26, %v977_v4  ;;  %v962_v4 = vadd.s32 4294967176, %v1856_v63  ;;  %vm1056_vm2 = vcmask 1041408  }
 0x211   :  { %v987_v11 = vsel %vm883_vm3, %v986_v29, %v982_v61  ;;  %v1001_v6 = vrot.slane %v1853_v36, %v902_v5  ;;  %v910_v9 = vrot.slane %v1851_v3, %v909_v62 }
 0x214   :  { %v747_v47 = vpop.xlane.xlu1 %746  ;;  %v792_v13 = vpop.xlane.xlu0 %791 }
 0x215   :  { %v991_v52 = vrot.slane %v792_v13, %v888_v38  ;;  %v896_v1 = vrot.slane %v747_v47, %v895_v41  ;;  %v941_v47 = vadd.s32 4294967200, %v1856_v63  ;;  %v948_v13 = vadd.s32 4294967192, %v1856_v63 }
 0x217   :  { %v992_v55 = vsel %vm890_vm4, %v991_v52, %v987_v11  ;;  %v898_v0 = vsel %vm897_vm5, %v896_v1, %v891_v40  ;;  %v951_v49 = vsub.s32 %v948_v13, %v1574_v17 }
 0x218   :  { %v1859_v18 = vpop.xlane.xlu1 %761  ;;  %v1861_v7 = vpop.xlane.xlu0 %800  ;;  %v905_v14 = vsel %vm904_vm6, %v903_v60, %v898_v0 }
 0x219   :  { %v1006_v36 = vrot.slane %v1861_v7, %v909_v62  ;;  %v912_v23 = vsel %vm911_vm7, %v910_v9, %v905_v14  ;;  %v944_v7 = vsub.s32 %v941_v47, %v1574_v17 }
 0x21c   :  { %v1864_v21 = vpop.xlane.xlu1 %755  ;;  %v795_v33 = vpop.xlane.xlu0 %794 }
 0x21d   :  { %v996_v50 = vrot.slane %v795_v33, %v895_v41  ;;  %v917_v28 = vrot.slane %v1864_v21, %v916_v56  ;;  %v955_v21 = vadd.s32 4294967184, %v1856_v63  ;;  %v931_v41 = vrot.slane %v1859_v18, %v930_v2 }
 0x21e   :  { %v965_v63 = vsub.s32 %v962_v4, %v1574_v17 }
 0x21f   :  { %v997_v53 = vsel %vm897_vm5, %v996_v50, %v992_v55  ;;  %v919_v22 = vsel %vm918_vm8, %v917_v28, %v912_v23  ;;  %v958_v39 = vsub.s32 %v955_v21, %v1574_v17 }
 0x220   :  { %v1872_v59 = vpop.xlane.xlu1 %764  ;;  %v1875_v19 = vpop.xlane.xlu0 %809  ;;  %v1002_v20 = vsel %vm904_vm6, %v1001_v6, %v997_v53 }
 0x221   :  { %v1007_v58 = vsel %vm911_vm7, %v1006_v36, %v1002_v20  ;;  %v938_v15 = vrot.slane %v1872_v59, %v937_v57 }
 0x224   :  { %v1880_v27 = vpop.xlane.xlu1 %758  ;;  %v804_v42 = vpop.xlane.xlu0 %803 }
 0x225   :  { %v1011_v33 = vrot.slane %v804_v42, %v916_v56  ;;  %v924_v25 = vrot.slane %v1880_v27, %v923_v30  ;;  %v1021_v27 = vrot.slane %v1875_v19, %v930_v2 }
 0x227   :  { %v1012_v3 = vsel %vm918_vm8, %v1011_v33, %v1007_v58  ;;  %v926_v37 = vsel %vm925_vm9, %v924_v25, %v919_v22 }
 0x228   :  { %v1886_v51 = vpop.xlane.xlu1 %773  ;;  %v1889_v16 = vpop.xlane.xlu0 %812  ;;  %v933_v48 = vsel %vm932_vm10, %v931_v41, %v926_v37 }
 0x229   :  { %v1026_v45 = vrot.slane %v1889_v16, %v937_v57  ;;  %v940_v19 = vsel %vm939_vm11, %v938_v15, %v933_v48  ;;  %v959_v29 = vrot.slane %v1886_v51, %v958_v39  ;;  %v1052_v51 = vld [vmem:[#allocation9] sm:$0x3] }
 0x22a   :  { %vm1053_vm1 = vcmp.ne.s32.totalorder %v1052_v51, 0 }
 0x22c   :  { %v807_v10 = vpop.xlane.xlu0 %806  ;;  %v768_v32 = vpop.xlane.xlu1 %767 }
 0x22d   :  { %v1016_v44 = vrot.slane %v807_v10, %v923_v30  ;;  %v945_v35 = vrot.slane %v768_v32, %v944_v7 }
 0x22f   :  { %v1017_v38 = vsel %vm925_vm9, %v1016_v44, %v1012_v3  ;;  %v947_v1 = vsel %vm946_vm12, %v945_v35, %v940_v19 }
 0x230   :  { %v822_v8 = vpop.xlane.xlu0 %821  ;;  %v771_v12 = vpop.xlane.xlu1 %770  ;;  %v1022_v42 = vsel %vm932_vm10, %v1021_v27, %v1017_v38 }
 0x231   :  { %v952_v61 = vrot.slane %v771_v12, %v951_v49  ;;  %v1027_v52 = vsel %vm939_vm11, %v1026_v45, %v1022_v42  ;;  %v1041_v16 = vrot.slane %v822_v8, %v958_v39 }
 0x233   :  { %v954_v5 = vsel %vm953_vm13, %v952_v61, %v947_v1 }
 0x234   :  { %v816_v26 = vpop.xlane.xlu0 %815  ;;  %v777_v18 = vpop.xlane.xlu1 %776  ;;  %v961_v40 = vsel %vm960_vm14, %v959_v29, %v954_v5 }
 0x235   :  { %v1031_v43 = vrot.slane %v816_v26, %v944_v7  ;;  %v966_v59 = vrot.slane %v777_v18, %v965_v63 }
 0x237   :  { %v1032_v50 = vsel %vm946_vm12, %v1031_v43, %v1027_v52  ;;  %v968_v55 = vsel %vm967_vm15, %v966_v59, %v961_v40 }
 0x238   :  { %v819_v46 = vpop.xlane.xlu0 %818 }
 0x239   :  { %v1036_v31 = vrot.slane %v819_v46, %v951_v49 }
 0x23b   :  { %v1037_v54 = vsel %vm953_vm13, %v1036_v31, %v1032_v50 }
 0x23c   :  { %v825_v11 = vpop.xlane.xlu0 %824  ;;  %v1042_v62 = vsel %vm960_vm14, %v1041_v16, %v1037_v54 }
 0x23d   :  { %v1046_v17 = vrot.slane %v825_v11, %v965_v63 }
 0x23f   :  { %v1047_v56 = vsel %vm967_vm15, %v1046_v17, %v1042_v62 }
 0x240   :  { %v1049_v0 = vsel %vm1048_vm0, %v1047_v56, %v968_v55 }
 0x241   :  { %1051 = vst [vmem:[#allocation2] sm:$0x3] %v1049_v0 }
 0x248   :  { %v1054_v53 = vld [vmem:[#allocation2] sm:$0x3] }
 0x249   :  { %v1055_v30 = vsel %vm1053_vm1, -inf, %v1054_v53 }
 0x24a   :  { %v1057_v60 = vsel %vm1056_vm2, %v1055_v30, -inf }
 0x24b   :  { %1058 = vmax.xlane.f32.xlu1 %v1057_v60 }
 0x2d8   :  { %v1059_v6 = vpop.xlane.xlu1 %1058 }
 0x2d9   :  { %v1060_v34 = vsub.f32 %v1055_v30, %v1059_v6 }
 0x2db   :  { %v1061_v10 = vmul.f32 1.442695, %v1060_v34 }
 0x2dd   :  { %1245 = vpow2.f32 %v1061_v10 }
 0x2e7   :  { %v1246_v32 = vpop.eup %1245 }
 0x2e8   :  { %v1063_v24 = vsel %vm1056_vm2, %v1246_v32, 0.0 }
 0x2e9   :  { %1064 = vadd.xlane.f32.xlu0 %v1063_v24 }
 0x376   :  { %v1065_v47 = vpop.xlane.xlu0 %1064 }
 0x377   :  { %1247 = vrcp.f32 %v1065_v47 }
 0x381   :  { %v1248_v13 = vpop.eup %1247 }
 0x382   :  { %v1067_v14 = vmul.f32 %v1248_v13, %v1246_v32 }
 0x384   :  { %1068 = vst [vmem:[#allocation15] sm:$0x3] %v1067_v14 }
 0x385   :  { %1414 = shalt.err (!%p1411_p4)
}
 0x386   :  { %s1415_s14 = scalar_lea.hbm %s1946_s7, 32 }
 0x387   :  { %p1416_p5 = scmp.ne.s32.totalorder %s1946_s7, %s1415_s14  ;;  %p1419_p6 = scmp.lt.u32.totalorder %s1415_s14, %s1946_s7 }
 0x389   :  { %p1421_p7 = pnand %p1419_p6, %p1416_p5 }
 0x38b   :  { %1424 = shalt.err (!%p1421_p7)
}
 0x38c   :  { %1078 = dma.vmem_to_hbm [thread:$0]  %s1076_s0, 32, %s1946_s7, [#allocation5]  }
 0x38d   :  { %1433 = dma.done.wait [#allocation5], 32  }
 0x38e   :  { %1434 = vsyncadd [#allocation5], 4294967264 }
 0x38f   :  { %1082 = vsyncpa [#allocation4], 1 }
 0x390   :  { %1083 = vsyncpa [#allocation7], 1 }
 0x391   :  { %1084 = vsyncpa [#allocation10], 1 }
 0x392   :  { %1085 = vsyncpa [#allocation13], 1 }
 0x393   :  { %1086 = vsyncpa [#allocation5], 1 }

// kernel: tpu_custom_call.1
= control target key start
LH: loop header
LB: loop body
LE: loop exit
PB: predicated region body
PF: predicated region fallthrough
CT: control target
= control target key end

     0   :  { %12 = vsyncpa [#allocation4], 0  ;;  %s1939_s0 = inlined_call_operand.hbm [shape: f32[2,32], index: 0, kind: input, shape index: {}]   ;;  %s1940_s1 = inlined_call_operand.hbm [shape: f32[2,128,32], index: 1, kind: input, shape index: {}]   ;;  %s1941_s2 = inlined_call_operand.hbm [shape: f32[2,128], index: 2, kind: input, shape index: {}]   ;;  %s1942_s3 = inlined_call_operand.hbm [shape: s32[2,128], index: 3, kind: input, shape index: {}]   ;;  %s1943_s4 = inlined_call_operand.hbm [shape: bf16[32,32], index: 4, kind: input, shape index: {}]   ;;  %s1944_s5 = inlined_call_operand.hbm [shape: f32[1,32], index: 5, kind: input, shape index: {}]   ;;  %s1945_s6 = inlined_call_operand.hbm [shape: f32[1,32], index: 6, kind: input, shape index: {}]   ;;  %s1946_s7 = inlined_call_operand.hbm [shape: f32[2,128], index: 7, kind: output, shape index: {}]  }
   0x1   :  { %13 = vsyncpa [#allocation7], 0 }
   0x2   :  { %14 = vsyncpa [#allocation10], 0 }
   0x3   :  { %15 = vsyncpa [#allocation13], 0 }
   0x4   :  { %16 = vsyncpa [#allocation5], 0  ;;  %s1435_s24 = smov [#allocation6]   ;;  %s1249_s28 = scalar_lea.hbm %s1940_s1, 4096 }
   0x5   :  { %s32_s25 = sshll.u32 %s1435_s24, 4  ;;  %p1250_p0 = scmp.ne.s32.totalorder %s1940_s1, %s1249_s28  ;;  %s33_s25 = int_to_ptr.vmem [resolvable:$true] %s32_s25 }
   0x6   :  { %p1253_p1 = scmp.lt.u32.totalorder %s1249_s28, %s1940_s1 }
   0x8   :  { %p1255_p2 = pnand %p1253_p1, %p1250_p0 }
   0xa   :  { %1258 = shalt.err (!%p1255_p2)
}
   0xb   :  { %s1259_s10 = scalar_lea.vmem %s33_s25, 4096  ;;  %p1264_p4 = scmp.lt.s32.totalorder %s33_s25, %s33_s25 }
   0xc   :  { %p1260_p3 = scmp.ne.s32.totalorder %s33_s25, %s1259_s10  ;;  %p1265_p5 = scmp.lt.s32.totalorder %s1259_s10, %s1259_s10 }
   0xe   :  { %p1266_p6 = por %p1265_p5, %p1264_p4 }
  0x10   :  { %p1267_p7 = pnand %p1266_p6, %p1260_p3 }
  0x12   :  { %1270 = shalt.err (!%p1267_p7)
}
  0x13   :  { %s1436_s11 = smov 128   ;;  %s1437_s12 = smov 8  }
  0x14   :  { %38 = dma.hbm_to_vmem [thread:$0]  %s1940_s1, 4096, %s33_s25, [#allocation7], %s1436_s11, %s1436_s11, %s1437_s12  }
  0x15   :  { %s1438_s15 = smov [#allocation9]   ;;  %s1439_s17 = smov [#allocation12]  }
  0x16   :  { %s55_s16 = sshll.u32 %s1438_s15, 4  ;;  %s77_s18 = sshll.u32 %s1439_s17, 4  ;;  %s56_s16 = int_to_ptr.vmem [resolvable:$true] %s55_s16  ;;  %s78_s18 = int_to_ptr.vmem [resolvable:$true] %s77_s18 }
  0x17   :  { %s1271_s21 = scalar_lea.hbm %s1942_s3, 32 }
  0x18   :  { %p1272_p8 = scmp.ne.s32.totalorder %s1942_s3, %s1271_s21  ;;  %p1275_p9 = scmp.lt.u32.totalorder %s1271_s21, %s1942_s3 }
  0x1a   :  { %p1277_p10 = pnand %p1275_p9, %p1272_p8 }
  0x1c   :  { %1280 = shalt.err (!%p1277_p10)
}
  0x1d   :  { %s1281_s1 = scalar_lea.vmem %s56_s16, 32  ;;  %p1286_p12 = scmp.lt.s32.totalorder %s56_s16, %s56_s16 }
  0x1e   :  { %p1282_p11 = scmp.ne.s32.totalorder %s56_s16, %s1281_s1  ;;  %p1287_p13 = scmp.lt.s32.totalorder %s1281_s1, %s1281_s1 }
  0x20   :  { %p1288_p0 = por %p1287_p13, %p1286_p12 }
  0x22   :  { %p1289_p1 = pnand %p1288_p0, %p1282_p11 }
  0x24   :  { %1292 = shalt.err (!%p1289_p1)
}
  0x25   :  { %58 = dma.hbm_to_vmem [thread:$0]  %s1942_s3, 32, %s56_s16, [#allocation10]  }
  0x26   :  { %s1293_s30 = scalar_lea.hbm %s1944_s5, 16 }
  0x27   :  { %p1294_p2 = scmp.ne.s32.totalorder %s1944_s5, %s1293_s30  ;;  %p1297_p3 = scmp.lt.u32.totalorder %s1293_s30, %s1944_s5 }
  0x29   :  { %p1299_p4 = pnand %p1297_p3, %p1294_p2 }
  0x2b   :  { %1302 = shalt.err (!%p1299_p4)
}
  0x2c   :  { %s1303_s12 = scalar_lea.vmem %s78_s18, 16  ;;  %s1307_s13 = scalar_lea.vmem %s78_s18, 32 }
  0x2d   :  { %p1304_p5 = scmp.ne.s32.totalorder %s78_s18, %s1303_s12  ;;  %p1308_p6 = scmp.lt.s32.totalorder %s78_s18, %s78_s18 }
  0x2e   :  { %p1309_p7 = scmp.lt.s32.totalorder %s1307_s13, %s1303_s12 }
  0x30   :  { %p1310_p8 = por %p1309_p7, %p1308_p6 }
  0x32   :  { %p1311_p9 = pnand %p1310_p8, %p1304_p5 }
  0x34   :  { %1314 = shalt.err (!%p1311_p9)
}
  0x35   :  { %80 = dma.hbm_to_vmem [thread:$0]  %s1944_s5, 16, %s78_s18, [#allocation13]  }
  0x36   :  { %s1440_s15 = smov [#allocation3]   ;;  %s1441_s17 = smov [#allocation8]  }
  0x37   :  { %s23_s16 = sshll.u32 %s1440_s15, 4  ;;  %s45_s19 = sshll.u32 %s1441_s17, 4  ;;  %s24_s16 = int_to_ptr.vmem [resolvable:$true] %s23_s16  ;;  %s46_s19 = int_to_ptr.vmem [resolvable:$true] %s45_s19 }
  0x38   :  { %s1315_s22 = scalar_lea.hbm %s1939_s0, 32 }
  0x39   :  { %p1316_p10 = scmp.ne.s32.totalorder %s1939_s0, %s1315_s22  ;;  %p1319_p11 = scmp.lt.u32.totalorder %s1315_s22, %s1939_s0 }
  0x3b   :  { %p1321_p12 = pnand %p1319_p11, %p1316_p10 }
  0x3d   :  { %1324 = shalt.err (!%p1321_p12)
}
  0x3e   :  { %s1325_s5 = scalar_lea.vmem %s24_s16, 32  ;;  %p1330_p0 = scmp.lt.s32.totalorder %s24_s16, %s24_s16 }
  0x3f   :  { %p1326_p13 = scmp.ne.s32.totalorder %s24_s16, %s1325_s5  ;;  %p1331_p1 = scmp.lt.s32.totalorder %s1325_s5, %s1325_s5 }
  0x41   :  { %p1332_p2 = por %p1331_p1, %p1330_p0 }
  0x43   :  { %p1333_p3 = pnand %p1332_p2, %p1326_p13 }
  0x45   :  { %1336 = shalt.err (!%p1333_p3)
}
  0x46   :  { %26 = dma.hbm_to_vmem [thread:$0]  %s1939_s0, 32, %s24_s16, [#allocation4]  }
  0x47   :  { %s1337_s29 = scalar_lea.hbm %s1941_s2, 32 }
  0x48   :  { %p1338_p4 = scmp.ne.s32.totalorder %s1941_s2, %s1337_s29  ;;  %p1341_p5 = scmp.lt.u32.totalorder %s1337_s29, %s1941_s2 }
  0x4a   :  { %p1343_p6 = pnand %p1341_p5, %p1338_p4 }
  0x4c   :  { %1346 = shalt.err (!%p1343_p6)
}
  0x4d   :  { %s1347_s11 = scalar_lea.vmem %s46_s19, 32  ;;  %p1352_p8 = scmp.lt.s32.totalorder %s46_s19, %s46_s19 }
  0x4e   :  { %p1348_p7 = scmp.ne.s32.totalorder %s46_s19, %s1347_s11  ;;  %p1353_p9 = scmp.lt.s32.totalorder %s1347_s11, %s1347_s11 }
  0x50   :  { %p1354_p10 = por %p1353_p9, %p1352_p8 }
  0x52   :  { %p1355_p11 = pnand %p1354_p10, %p1348_p7 }
  0x54   :  { %1358 = shalt.err (!%p1355_p11)
}
  0x55   :  { %48 = dma.hbm_to_vmem [thread:$0]  %s1941_s2, 32, %s46_s19, [#allocation7]  }
  0x56   :  { %s1442_s13 = smov [#allocation11]   ;;  %s1359_s16 = scalar_lea.hbm %s1943_s4, 256 }
  0x57   :  { %s64_s3 = sshll.u32 %s1442_s13, 4  ;;  %p1360_p12 = scmp.ne.s32.totalorder %s1943_s4, %s1359_s16  ;;  %s65_s3 = int_to_ptr.vmem [resolvable:$true] %s64_s3 }
  0x58   :  { %p1363_p13 = scmp.lt.u32.totalorder %s1359_s16, %s1943_s4 }
  0x5a   :  { %p1365_p0 = pnand %p1363_p13, %p1360_p12 }
  0x5c   :  { %1368 = shalt.err (!%p1365_p0)
}
  0x5d   :  { %s1369_s23 = scalar_lea.vmem %s65_s3, 256  ;;  %p1374_p2 = scmp.lt.s32.totalorder %s65_s3, %s65_s3 }
  0x5e   :  { %p1370_p1 = scmp.ne.s32.totalorder %s65_s3, %s1369_s23  ;;  %p1375_p3 = scmp.lt.s32.totalorder %s1369_s23, %s1369_s23 }
  0x60   :  { %p1376_p4 = por %p1375_p3, %p1374_p2 }
  0x62   :  { %p1377_p5 = pnand %p1376_p4, %p1370_p1 }
  0x64   :  { %1380 = shalt.err (!%p1377_p5)
}
  0x65   :  { %s1443_s2 = smov 64   ;;  %s1444_s19 = smov 4  }
  0x66   :  { %70 = dma.hbm_to_vmem [thread:$0]  %s1943_s4, 256, %s65_s3, [#allocation10], %s1443_s2, %s1443_s2, %s1444_s19  }
  0x67   :  { %s1445_s1 = smov [#allocation14]   ;;  %s1381_s27 = scalar_lea.hbm %s1945_s6, 16 }
  0x68   :  { %s87_s5 = sshll.u32 %s1445_s1, 4  ;;  %p1382_p6 = scmp.ne.s32.totalorder %s1945_s6, %s1381_s27  ;;  %s88_s5 = int_to_ptr.vmem [resolvable:$true] %s87_s5 }
  0x69   :  { %p1385_p7 = scmp.lt.u32.totalorder %s1381_s27, %s1945_s6 }
  0x6b   :  { %p1387_p8 = pnand %p1385_p7, %p1382_p6 }
  0x6d   :  { %1390 = shalt.err (!%p1387_p8)
}
  0x6e   :  { %s1391_s9 = scalar_lea.vmem %s88_s5, 16  ;;  %s1395_s4 = scalar_lea.vmem %s88_s5, 32 }
  0x6f   :  { %p1392_p9 = scmp.ne.s32.totalorder %s88_s5, %s1391_s9  ;;  %p1396_p10 = scmp.lt.s32.totalorder %s88_s5, %s88_s5 }
  0x70   :  { %p1397_p11 = scmp.lt.s32.totalorder %s1395_s4, %s1391_s9 }
  0x72   :  { %p1398_p12 = por %p1397_p11, %p1396_p10 }
  0x74   :  { %p1399_p13 = pnand %p1398_p12, %p1392_p9 }
  0x76   :  { %1402 = shalt.err (!%p1399_p13)
}
  0x77   :  { %90 = dma.hbm_to_vmem [thread:$0]  %s1945_s6, 16, %s88_s5, [#allocation13]  }
  0x78   :  { %1425 = dma.done.wait [#allocation4], 32  }
  0x79   :  { %1426 = vsyncadd [#allocation4], 4294967264 }
  0x7a   :  { %1427 = dma.done.wait [#allocation7], 4128  }
  0x7b   :  { %1428 = vsyncadd [#allocation7], 4294963168 }
  0x7c   :  { %1429 = dma.done.wait [#allocation10], 288  }
  0x7d   :  { %1430 = vsyncadd [#allocation10], 4294967008 }
  0x7e   :  { %1431 = dma.done.wait [#allocation13], 32  }
  0x7f   :  { %1432 = vsyncadd [#allocation13], 4294967264  ;;  %v1179_v0 = vld [vmem:[#allocation11] sm:$0xff]   ;;  %v1180_v1 = vld [vmem:[#allocation11 + $0x8] sm:$0xff]   ;;  %v130_v2 = vlaneseq  ;;  %vm203_vm0 = vcmask 261120   ;;  %vm869_vm1 = vcmask 130112  }
  0x80   :  { %1126 = vmatprep.subr.bf16.mxu0 %v1179_v0  ;;  %1162 = vmatprep.subr.bf16.mxu1 %v1179_v0  ;;  %v143_v3 = vld [vmem:[#allocation6] sm:$0xff]  ;;  %v144_v4 = vld [vmem:[#allocation6 + $0x8] sm:$0xff]  ;;  %v145_v8 = vld [vmem:[#allocation6 + $0x10] sm:$0xff]  ;;  %vm876_vm2 = vcmask 195712   ;;  %vm883_vm3 = vcmask 261312   ;;  %vm890_vm4 = vcmask 326912  }
  0x81   :  { %v159_v5 = vld [vmem:[#allocation6 + $0x80] sm:$0xff]  ;;  %1127 = vmatpush3.bf16.msra.mxu0 %v1179_v0  ;;  %1164 = vmatpush3.bf16.msra.mxu1 %v1179_v0  ;;  %v175_v6 = vpack.c.bf16 %v144_v4, %v143_v3  ;;  %v160_v7 = vld [vmem:[#allocation6 + $0x88] sm:$0xff]  ;;  %v146_v9 = vld [vmem:[#allocation6 + $0x18] sm:$0xff]  ;;  %v1574_v17 = vshrl.u32 %v130_v2, 7  ;;  %vm897_vm5 = vcmask 392512   ;;  %vm904_vm6 = vcmask 458112  }
  0x82   :  { %1128 = vmatprep.subr.bf16.mxu0 %v1180_v1  ;;  %1163 = vmatprep.subr.bf16.mxu1 %v1180_v1  ;;  %v183_v10 = vpack.c.bf16 %v160_v7, %v159_v5  ;;  %v161_v11 = vld [vmem:[#allocation6 + $0x90] sm:$0xff]  ;;  %v162_v12 = vld [vmem:[#allocation6 + $0x98] sm:$0xff]  ;;  %v147_v13 = vld [vmem:[#allocation6 + $0x20] sm:$0xff]  ;;  %v176_v18 = vpack.c.bf16 %v146_v9, %v145_v8  ;;  %v1446_v9 = vmov 1966171168   ;;  %vm911_vm7 = vcmask 523712  }
  0x83   :  { %1130 = vmatprep.mubr.msk.bf16.mxu0 %vm203_vm0, %v175_v6  ;;  %v148_v14 = vld [vmem:[#allocation6 + $0x28] sm:$0xff]  ;;  %v163_v15 = vld [vmem:[#allocation6 + $0xa0] sm:$0xff]  ;;  %v184_v19 = vpack.c.bf16 %v162_v12, %v161_v11  ;;  %v1578_v22 = vsub.s32 0, %v1574_v17  ;;  %v483_v23 = vsub.s32 1, %v1574_v17  ;;  %v149_v24 = vld [vmem:[#allocation6 + $0x30] sm:$0xff]  ;;  %vm918_vm8 = vcmask 589312  }
  0x84   :  { %v164_v16 = vld [vmem:[#allocation6 + $0xa8] sm:$0xff]  ;;  %1146 = vmatprep.mubr.msk.bf16.mxu1 %vm203_vm0, %v183_v10  ;;  %v177_v20 = vpack.c.bf16 %v148_v14, %v147_v13  ;;  %v150_v25 = vld [vmem:[#allocation6 + $0x38] sm:$0xff]  ;;  %v165_v26 = vld [vmem:[#allocation6 + $0xb0] sm:$0xff]  ;;  %v128_v10 = vunpack.c.l.s4 %v1446_v9  ;;  %vm925_vm9 = vcmask 654912   ;;  %vm932_vm10 = vcmask 720512   ;;  %s1447_s6 = smov [#allocation15]  }
  0x85   :  { %1129 = vmatpush3.bf16.msra.mxu0 %v1180_v1  ;;  %1165 = vmatpush3.bf16.msra.mxu1 %v1180_v1  ;;  %v185_v21 = vpack.c.bf16 %v164_v16, %v163_v15  ;;  %v166_v27 = vld [vmem:[#allocation6 + $0xb8] sm:$0xff]  ;;  %v151_v28 = vld [vmem:[#allocation6 + $0x40] sm:$0xff]  ;;  %v152_v29 = vld [vmem:[#allocation6 + $0x48] sm:$0xff]  ;;  %v178_v35 = vpack.c.bf16 %v150_v25, %v149_v24  ;;  %vm939_vm11 = vcmask 786112   ;;  %vm946_vm12 = vcmask 851712   ;;  %s1075_s0 = sshll.u32 %s1447_s6, 4  ;;  %s1076_s0 = int_to_ptr.vmem [resolvable:$true] %s1075_s0 }
  0x86   :  { %v167_v30 = vld [vmem:[#allocation6 + $0xc0] sm:$0xff]  ;;  %v168_v31 = vld [vmem:[#allocation6 + $0xc8] sm:$0xff]  ;;  %v186_v36 = vpack.c.bf16 %v166_v27, %v165_v26  ;;  %v179_v37 = vpack.c.bf16 %v152_v29, %v151_v28  ;;  %v153_v39 = vld [vmem:[#allocation6 + $0x50] sm:$0xff]  ;;  %v129_v13 = vunpack.c.0.s8 %v128_v10  ;;  %vm953_vm13 = vcmask 917312   ;;  %s1403_s12 = scalar_lea.vmem %s1076_s0, 32  ;;  %p1408_p1 = scmp.lt.s32.totalorder %s1076_s0, %s1076_s0 }
  0x87   :  { %v413_v32 = vld [vmem:[#allocation8] sm:$0x3]  ;;  %v187_v38 = vpack.c.bf16 %v168_v31, %v167_v30  ;;  %v154_v40 = vld [vmem:[#allocation6 + $0x58] sm:$0xff]  ;;  %v169_v41 = vld [vmem:[#allocation6 + $0xd0] sm:$0xff]  ;;  %vm960_vm14 = vcmask 982912   ;;  %vm967_vm15 = vcmask 1048512   ;;  %p1404_p0 = scmp.ne.s32.totalorder %s1076_s0, %s1403_s12  ;;  %p1409_p2 = scmp.lt.s32.totalorder %s1403_s12, %s1403_s12 }
  0x88   :  { %1131 = vmatmul.mubr.msk.bf16.vlgmr.msra.gmra.mrb[0].mxu0 %vm203_vm0, %v176_v18  ;;  %1147 = vmatmul.mubr.msk.bf16.vlgmr.msra.gmra.mrb[0].mxu1 %vm203_vm0, %v184_v19  ;;  %v1586_v33 = vrot.slane %v413_v32, %v1578_v22  ;;  %v484_v34 = vrot.slane %v413_v32, %v483_v23  ;;  %v170_v42 = vld [vmem:[#allocation6 + $0xd8] sm:$0xff]  ;;  %v155_v43 = vld [vmem:[#allocation6 + $0x60] sm:$0xff]  ;;  %v156_v44 = vld [vmem:[#allocation6 + $0x68] sm:$0xff]  ;;  %v180_v47 = vpack.c.bf16 %v154_v40, %v153_v39 }
  0x89   :  { %1134 = vmatprep.mubr.msk.bf16.mxu0 %vm203_vm0, %v177_v20  ;;  %1150 = vmatprep.mubr.msk.bf16.mxu1 %vm203_vm0, %v185_v21  ;;  %v171_v45 = vld [vmem:[#allocation6 + $0xe0] sm:$0xff]  ;;  %v172_v46 = vld [vmem:[#allocation6 + $0xe8] sm:$0xff]  ;;  %v188_v48 = vpack.c.bf16 %v170_v42, %v169_v41  ;;  %v181_v49 = vpack.c.bf16 %v156_v44, %v155_v43  ;;  %v157_v51 = vld [vmem:[#allocation6 + $0x70] sm:$0xff]  ;;  %v132_v18 = vsub.s32 %v129_v13, %v1574_v17  ;;  %p1410_p3 = por %p1409_p2, %p1408_p1 }
  0x8a   :  { %419 = vbcast.lane.b32.xlu0 %v1586_v33, 256  ;;  %486 = vbcast.lane.b32.xlu1 %v484_v34, 256  ;;  %v189_v50 = vpack.c.bf16 %v172_v46, %v171_v45  ;;  %v158_v52 = vld [vmem:[#allocation6 + $0x78] sm:$0xff]  ;;  %v173_v53 = vld [vmem:[#allocation6 + $0xf0] sm:$0xff] }
  0x8b   :  { %v174_v54 = vld [vmem:[#allocation6 + $0xf8] sm:$0xff]  ;;  %v182_v55 = vpack.c.bf16 %v158_v52, %v157_v51  ;;  %v1645_v27 = vld [vmem:[#allocation12] ss:$0 sm:$0xff]  ;;  %p1411_p4 = pnand %p1410_p3, %p1404_p0 }
  0x8c   :  { %v190_v56 = vpack.c.bf16 %v174_v54, %v173_v53  ;;  %v1087_v14 = vld.sshfl [vmem:[#allocation3] sm:$0x11 pattern:$0x75316420] }
  0x8d   :  { %v126_v19 = vcombine.high %v1087_v14, %v1087_v14  ;;  %v133_v20 = vrot.slane %v1087_v14, %v132_v18 }
  0x8e   :  { %423 = vbcast.lane.b32.xlu0 %v1586_v33, 264  ;;  %490 = vbcast.lane.b32.xlu1 %v484_v34, 264 }
  0x8f   :  { %v140_v21 = vrot.slane %v126_v19, %v132_v18  ;;  %v1640_v25 = vrot.slane %v133_v20, %v1578_v22 }
  0x90   :  { %1135 = vmatmul.mubr.msk.bf16.gmra.mrb[4].mxu0 %vm203_vm0, %v178_v35  ;;  %1151 = vmatmul.mubr.msk.bf16.gmra.mrb[4].mxu1 %vm203_vm0, %v186_v36 }
  0x91   :  { %1138 = vmatprep.mubr.msk.bf16.mxu0 %vm203_vm0, %v179_v37  ;;  %1154 = vmatprep.mubr.msk.bf16.mxu1 %vm203_vm0, %v187_v38  ;;  %v1643_v26 = vrot.slane %v140_v21, %v1578_v22 }
  0x92   :  { %427 = vbcast.lane.b32.xlu0 %v1586_v33, 272  ;;  %494 = vbcast.lane.b32.xlu1 %v484_v34, 272 }
  0x96   :  { %431 = vbcast.lane.b32.xlu0 %v1586_v33, 280  ;;  %498 = vbcast.lane.b32.xlu1 %v484_v34, 280 }
  0x98   :  { %1139 = vmatmul.mubr.msk.bf16.gmra.mrb[8].mxu0 %vm203_vm0, %v180_v47  ;;  %1155 = vmatmul.mubr.msk.bf16.gmra.mrb[8].mxu1 %vm203_vm0, %v188_v48 }
  0x99   :  { %1142 = vmatprep.mubr.msk.bf16.mxu0 %vm203_vm0, %v181_v49  ;;  %1158 = vmatprep.mubr.msk.bf16.mxu1 %vm203_vm0, %v189_v50 }
  0x9a   :  { %435 = vbcast.lane.b32.xlu0 %v1586_v33, 288  ;;  %502 = vbcast.lane.b32.xlu1 %v484_v34, 288 }
  0x9e   :  { %439 = vbcast.lane.b32.xlu0 %v1586_v33, 296  ;;  %506 = vbcast.lane.b32.xlu1 %v484_v34, 296 }
  0xa0   :  { %1143 = vmatmul.mubr.msk.bf16.gmra.mrb[12].mxu0 %vm203_vm0, %v182_v55  ;;  %1159 = vmatmul.mubr.msk.bf16.gmra.mrb[12].mxu1 %vm203_vm0, %v190_v56 }
  0xa2   :  { %443 = vbcast.lane.b32.xlu0 %v1586_v33, 304  ;;  %510 = vbcast.lane.b32.xlu1 %v484_v34, 304 }
  0xa6   :  { %447 = vbcast.lane.b32.xlu0 %v1586_v33, 312  ;;  %514 = vbcast.lane.b32.xlu1 %v484_v34, 312 }
  0xaa   :  { %451 = vbcast.lane.b32.xlu0 %v1586_v33, 320  ;;  %518 = vbcast.lane.b32.xlu1 %v484_v34, 320 }
  0xae   :  { %455 = vbcast.lane.b32.xlu0 %v1586_v33, 328  ;;  %522 = vbcast.lane.b32.xlu1 %v484_v34, 328 }
  0xb2   :  { %459 = vbcast.lane.b32.xlu0 %v1586_v33, 336  ;;  %526 = vbcast.lane.b32.xlu1 %v484_v34, 336 }
  0xb6   :  { %463 = vbcast.lane.b32.xlu0 %v1586_v33, 344  ;;  %530 = vbcast.lane.b32.xlu1 %v484_v34, 344 }
  0xba   :  { %467 = vbcast.lane.b32.xlu0 %v1586_v33, 352  ;;  %534 = vbcast.lane.b32.xlu1 %v484_v34, 352 }
  0xbe   :  { %471 = vbcast.lane.b32.xlu0 %v1586_v33, 360  ;;  %538 = vbcast.lane.b32.xlu1 %v484_v34, 360 }
  0xc2   :  { %475 = vbcast.lane.b32.xlu0 %v1586_v33, 368  ;;  %542 = vbcast.lane.b32.xlu1 %v484_v34, 368 }
  0xc6   :  { %546 = vbcast.lane.b32.xlu1 %v484_v34, 376  ;;  %479 = vbcast.lane.b32.xlu0 %v1586_v33, 376 }
  0xfc   :  { %v487_v57 = vpop.permute.xlu1 %486  ;;  %v420_v58 = vpop.permute.xlu0 %419 }
  0xfd   :  { %v554_v38 = vmul.f32 %v1645_v27, %v420_v58  ;;  %v570_v48 = vmul.f32 %v1645_v27, %v487_v57 }
 0x100   :  { %v1614_v59 = vpop.permute.xlu1 %490  ;;  %v424_v60 = vpop.permute.xlu0 %423 }
 0x101   :  { %v555_v51 = vmul.f32 %v1645_v27, %v424_v60 }
 0x104   :  { %v495_v61 = vpop.permute.xlu1 %494  ;;  %v428_v62 = vpop.permute.xlu0 %427 }
 0x105   :  { %v556_v28 = vmul.f32 %v1645_v27, %v428_v62  ;;  %v572_v29 = vmul.f32 %v1645_v27, %v495_v61 }
 0x108   :  { %v499_v63 = vpop.permute.xlu1 %498  ;;  %v432_v0 = vpop.permute.xlu0 %431 }
 0x109   :  { %v557_v34 = vmul.f32 %v1645_v27, %v432_v0  ;;  %v573_v54 = vmul.f32 %v1645_v27, %v499_v63 }
 0x10c   :  { %v1616_v1 = vpop.permute.xlu1 %502  ;;  %v436_v3 = vpop.permute.xlu0 %435 }
 0x10d   :  { %v558_v60 = vmul.f32 %v1645_v27, %v436_v3 }
 0x110   :  { %v1618_v4 = vpop.permute.xlu1 %506  ;;  %v1620_v5 = vpop.permute.xlu0 %439 }
 0x114   :  { %v1622_v6 = vpop.permute.xlu1 %510  ;;  %v444_v7 = vpop.permute.xlu0 %443 }
 0x115   :  { %v560_v58 = vmul.f32 %v1645_v27, %v444_v7 }
 0x118   :  { %v1624_v8 = vpop.permute.xlu1 %514  ;;  %v1626_v11 = vpop.permute.xlu0 %447 }
 0x11c   :  { %v1628_v12 = vpop.permute.xlu1 %518  ;;  %v1630_v15 = vpop.permute.xlu0 %451 }
 0x120   :  { %v1632_v16 = vpop.permute.xlu1 %522  ;;  %v1635_v23 = vpop.permute.xlu0 %455 }
 0x124   :  { %v1637_v24 = vpop.permute.xlu1 %526  ;;  %v1649_v30 = vpop.permute.xlu0 %459 }
 0x128   :  { %v1651_v31 = vpop.permute.xlu1 %530  ;;  %v1666_v61 = vpop.permute.xlu0 %463 }
 0x12c   :  { %v1668_v57 = vpop.permute.xlu1 %534 }
 0x15b   :  { %v1132_v32 = vpop.f32.mrb[0].mxu0  ;;  %v1148_v33 = vpop.f32.mrb[0].mxu1 }
 0x15c   :  { %v598_v35 = vadd.f32 %v1132_v32, %v1640_v25  ;;  %v614_v36 = vadd.f32 %v1148_v33, %v1643_v26  ;;  %v286_v22 = vpop.f32.mrb[1].mxu0  ;;  %v350_v37 = vpop.f32.mrb[1].mxu1  ;;  %v571_v32 = vmul.f32 %v1645_v27, %v1614_v59  ;;  %v574_v59 = vmul.f32 %v1645_v27, %v1616_v1 }
 0x15d   :  { %v596_v39 = vadd.f32 %v1640_v25, %v286_v22  ;;  %v612_v40 = vadd.f32 %v1643_v26, %v350_v37  ;;  %v1133_v41 = vpop.f32.mrb[2].mxu0  ;;  %v1149_v42 = vpop.f32.mrb[2].mxu1 }
 0x15e   :  { %v630_v43 = vadd.f32 %v598_v35, %v556_v28  ;;  %v646_v44 = vadd.f32 %v614_v36, %v572_v29  ;;  %v599_v45 = vadd.f32 %v1133_v41, %v1640_v25  ;;  %v289_v46 = vpop.f32.mrb[3].mxu0  ;;  %v353_v47 = vpop.f32.mrb[3].mxu1  ;;  %v615_v55 = vadd.f32 %v1149_v42, %v1643_v26  ;;  %v1684_v36 = vld [vmem:[#allocation14] ss:$0 sm:$0xff] }
 0x15f   :  { %v628_v49 = vadd.f32 %v596_v39, %v554_v38  ;;  %v597_v50 = vadd.f32 %v1640_v25, %v289_v46  ;;  %v644_v53 = vadd.f32 %v612_v40, %v570_v48  ;;  %v613_v14 = vadd.f32 %v1643_v26, %v353_v47  ;;  %v1688_v39 = vpop.permute.xlu1 %538 }
 0x160   :  { %1181 = vtanh.f32 %v630_v43  ;;  %v631_v52 = vadd.f32 %v599_v45, %v557_v34  ;;  %v647_v63 = vadd.f32 %v615_v55, %v573_v54  ;;  %v561_v28 = vmul.f32 %v1645_v27, %v1626_v11  ;;  %v1686_v11 = vpop.permute.xlu0 %467 }
 0x161   :  { %1183 = vtanh.f32 %v646_v44  ;;  %v629_v56 = vadd.f32 %v597_v50, %v555_v51  ;;  %v576_v34 = vmul.f32 %v1645_v27, %v1622_v6  ;;  %v645_v22 = vadd.f32 %v613_v14, %v571_v32 }
 0x162   :  { %1185 = vtanh.f32 %v628_v49  ;;  %v559_v45 = vmul.f32 %v1645_v27, %v1620_v5  ;;  %v564_v51 = vmul.f32 %v1645_v27, %v1649_v30 }
 0x163   :  { %v1136_v62 = vpop.f32.mrb[4].mxu0  ;;  %v1152_v0 = vpop.f32.mrb[4].mxu1  ;;  %1187 = vtanh.f32 %v631_v52 }
 0x164   :  { %v602_v9 = vadd.f32 %v1136_v62, %v1640_v25  ;;  %v302_v10 = vpop.f32.mrb[5].mxu0  ;;  %v366_v13 = vpop.f32.mrb[5].mxu1  ;;  %1189 = vtanh.f32 %v644_v53  ;;  %v618_v33 = vadd.f32 %v1152_v0, %v1643_v26 }
 0x165   :  { %v600_v18 = vadd.f32 %v1640_v25, %v302_v10  ;;  %v1137_v7 = vpop.f32.mrb[6].mxu0  ;;  %v1153_v19 = vpop.f32.mrb[6].mxu1  ;;  %1191 = vtanh.f32 %v629_v56  ;;  %v616_v1 = vadd.f32 %v1643_v26, %v366_v13  ;;  %v577_v10 = vmul.f32 %v1645_v27, %v1624_v8 }
 0x166   :  { %v634_v20 = vadd.f32 %v602_v9, %v560_v58  ;;  %v603_v21 = vadd.f32 %v1137_v7, %v1640_v25  ;;  %v305_v3 = vpop.f32.mrb[7].mxu0  ;;  %v1677_v29 = vpop.f32.mrb[7].mxu1  ;;  %v650_v41 = vadd.f32 %v618_v33, %v576_v34  ;;  %v575_v8 = vmul.f32 %v1645_v27, %v1618_v4 }
 0x167   :  { %v632_v35 = vadd.f32 %v600_v18, %v558_v60  ;;  %v601_v46 = vadd.f32 %v1640_v25, %v305_v3  ;;  %v648_v13 = vadd.f32 %v616_v1, %v574_v59  ;;  %v1722_v3 = vpop.permute.xlu0 %471  ;;  %v1724_v32 = vpop.permute.xlu1 %542  ;;  %v617_v4 = vadd.f32 %v1643_v26, %v1677_v29 }
 0x168   :  { %1193 = vtanh.f32 %v634_v20  ;;  %v635_v38 = vadd.f32 %v603_v21, %v561_v28 }
 0x169   :  { %1195 = vtanh.f32 %v647_v63  ;;  %v633_v9 = vadd.f32 %v601_v46, %v559_v45  ;;  %v619_v63 = vadd.f32 %v1153_v19, %v1643_v26 }
 0x16a   :  { %v1182_v37 = vpop.eup %1181  ;;  %1197 = vtanh.f32 %v632_v35 }
 0x16b   :  { %v1184_v40 = vpop.eup %1183  ;;  %v700_v42 = vmul.f32 %v1182_v37, %v1684_v36  ;;  %v1693_v6 = vpop.f32.mrb[8].mxu1  ;;  %1199 = vtanh.f32 %v645_v22  ;;  %v562_v22 = vmul.f32 %v1645_v27, %v1630_v15 }
 0x16c   :  { %v1140_v43 = vpop.f32.mrb[8].mxu0  ;;  %v1186_v44 = vpop.eup %1185  ;;  %v716_v47 = vmul.f32 %v1184_v40, %v1684_v36  ;;  %1201 = vtanh.f32 %v635_v38  ;;  %v565_v38 = vmul.f32 %v1645_v27, %v1666_v61  ;;  %v622_v1 = vadd.f32 %v1693_v6, %v1643_v26 }
 0x16d   :  { %v318_v48 = vpop.f32.mrb[9].mxu0  ;;  %v1699_v49 = vpop.f32.mrb[9].mxu1  ;;  %v736_v50 = vsel %vm203_vm0, %v700_v42, 0.0  ;;  %v698_v55 = vmul.f32 %v1186_v44, %v1684_v36  ;;  %v606_v56 = vadd.f32 %v1140_v43, %v1640_v25  ;;  %1203 = vtanh.f32 %v650_v41 }
 0x16e   :  { %v1705_v52 = vpop.f32.mrb[10].mxu1  ;;  %v1141_v53 = vpop.f32.mrb[10].mxu0  ;;  %v784_v54 = vsel %vm203_vm0, %v716_v47, 0.0  ;;  %737 = vadd.xlane.f32.xlu1 %v736_v50  ;;  %1205 = vtanh.f32 %v633_v9  ;;  %v604_v37 = vadd.f32 %v1640_v25, %v318_v48  ;;  %v651_v41 = vadd.f32 %v619_v63, %v577_v10 }
 0x16f   :  { %v1188_v5 = vpop.eup %1187  ;;  %v1710_v58 = vpop.f32.mrb[11].mxu0  ;;  %785 = vadd.xlane.f32.xlu0 %v784_v54  ;;  %v730_v20 = vsel %vm203_vm0, %v698_v55, 0.0  ;;  %v638_v28 = vadd.f32 %v606_v56, %v564_v51  ;;  %1207 = vtanh.f32 %v648_v13  ;;  %v607_v46 = vadd.f32 %v1141_v53, %v1640_v25 }
 0x170   :  { %v1712_v62 = vpop.f32.mrb[11].mxu1  ;;  %v1190_v0 = vpop.eup %1189  ;;  %v701_v30 = vmul.f32 %v1188_v5, %v1684_v36  ;;  %v580_v51 = vmul.f32 %v1645_v27, %v1637_v24  ;;  %v636_v54 = vadd.f32 %v604_v37, %v562_v22 }
 0x171   :  { %v1192_v60 = vpop.eup %1191  ;;  %v714_v21 = vmul.f32 %v1190_v0, %v1684_v36  ;;  %1209 = vtanh.f32 %v638_v28  ;;  %v547_v55 = vpop.permute.xlu1 %546  ;;  %v649_v0 = vadd.f32 %v617_v4, %v575_v8 }
 0x172   :  { %v739_v14 = vsel %vm203_vm0, %v701_v30, 0.0  ;;  %v699_v18 = vmul.f32 %v1192_v60, %v1684_v36  ;;  %v1194_v7 = vpop.eup %1193  ;;  %1211 = vtanh.f32 %v651_v41  ;;  %v639_v60 = vadd.f32 %v607_v46, %v565_v38  ;;  %v476_v13 = vpop.permute.xlu0 %475 }
 0x173   :  { %740 = vadd.xlane.f32.xlu1 %v739_v14  ;;  %v1196_v33 = vpop.eup %1195  ;;  %731 = vadd.xlane.f32.xlu0 %v730_v20  ;;  %v704_v19 = vmul.f32 %v1194_v7, %v1684_v36  ;;  %v1729_v34 = vpop.f32.mrb[12].mxu1  ;;  %v778_v45 = vsel %vm203_vm0, %v714_v21, 0.0  ;;  %v654_v10 = vadd.f32 %v622_v1, %v580_v51  ;;  %v585_v63 = vmul.f32 %v1645_v27, %v547_v55 }
 0x174   :  { %v1144_v35 = vpop.f32.mrb[12].mxu0  ;;  %v1738_v59 = vpop.f32.mrb[13].mxu1  ;;  %v733_v42 = vsel %vm203_vm0, %v699_v18, 0.0  ;;  %v717_v61 = vmul.f32 %v1196_v33, %v1684_v36  ;;  %v563_v14 = vmul.f32 %v1645_v27, %v1635_v23  ;;  %1213 = vtanh.f32 %v636_v54 }
 0x175   :  { %v1736_v40 = vpop.f32.mrb[13].mxu0  ;;  %v1161_v43 = vpop.f32.mrb[14].mxu1  ;;  %v748_v50 = vsel %vm203_vm0, %v704_v19, 0.0  ;;  %v605_v18 = vadd.f32 %v1640_v25, %v1710_v58  ;;  %1215 = vtanh.f32 %v649_v0  ;;  %v578_v20 = vmul.f32 %v1645_v27, %v1628_v12 }
 0x176   :  { %v1743_v44 = vpop.f32.mrb[14].mxu0  ;;  %v1198_v15 = vpop.eup %1197  ;;  %v787_v30 = vsel %vm203_vm0, %v717_v61, 0.0  ;;  %v627_v9 = vadd.f32 %v1161_v43, %v1643_v26  ;;  %v620_v21 = vadd.f32 %v1643_v26, %v1699_v49  ;;  %1217 = vtanh.f32 %v639_v60 }
 0x177   :  { %734 = vadd.xlane.f32.xlu1 %v733_v42  ;;  %v1748_v47 = vpop.f32.mrb[15].mxu0  ;;  %v1750_v48 = vpop.f32.mrb[15].mxu1  ;;  %779 = vadd.xlane.f32.xlu0 %v778_v45  ;;  %v702_v53 = vmul.f32 %v1198_v15, %v1684_v36  ;;  %v610_v23 = vadd.f32 %v1144_v35, %v1640_v25  ;;  %v568_v58 = vmul.f32 %v1645_v27, %v476_v13  ;;  %1219 = vtanh.f32 %v654_v10 }
 0x178   :  { %v1200_v29 = vpop.eup %1199  ;;  %v659_v12 = vadd.f32 %v627_v9, %v585_v63  ;;  %v637_v38 = vadd.f32 %v605_v18, %v563_v14  ;;  %v652_v4 = vadd.f32 %v620_v21, %v578_v20  ;;  %v623_v41 = vadd.f32 %v1705_v52, %v1643_v26 }
 0x179   :  { %v1202_v5 = vpop.eup %1201  ;;  %v715_v6 = vmul.f32 %v1200_v29, %v1684_v36  ;;  %v742_v28 = vsel %vm203_vm0, %v702_v53, 0.0  ;;  %v581_v42 = vmul.f32 %v1645_v27, %v1651_v31  ;;  %v642_v15 = vadd.f32 %v610_v23, %v568_v58 }
 0x17a   :  { %v1204_v56 = vpop.eup %1203  ;;  %v705_v24 = vmul.f32 %v1202_v5, %v1684_v36  ;;  %1221 = vtanh.f32 %v659_v12  ;;  %v579_v46 = vmul.f32 %v1645_v27, %v1632_v16  ;;  %v566_v52 = vmul.f32 %v1645_v27, %v1686_v11 }
 0x17b   :  { %749 = vadd.xlane.f32.xlu1 %v748_v50  ;;  %788 = vadd.xlane.f32.xlu0 %v787_v30  ;;  %v720_v7 = vmul.f32 %v1204_v56, %v1684_v36  ;;  %v1206_v33 = vpop.eup %1205  ;;  %v781_v8 = vsel %vm203_vm0, %v715_v6, 0.0  ;;  %1223 = vtanh.f32 %v637_v38  ;;  %v608_v31 = vadd.f32 %v1640_v25, %v1736_v40  ;;  %v480_v30 = vpop.permute.xlu0 %479 }
 0x17c   :  { %v1208_v19 = vpop.eup %1207  ;;  %v751_v22 = vsel %vm203_vm0, %v705_v24, 0.0  ;;  %v703_v35 = vmul.f32 %v1206_v33, %v1684_v36  ;;  %1225 = vtanh.f32 %v652_v4  ;;  %v621_v29 = vadd.f32 %v1643_v26, %v1712_v62 }
 0x17d   :  { %v1210_v37 = vpop.eup %1209  ;;  %v796_v49 = vsel %vm203_vm0, %v720_v7, 0.0  ;;  %v718_v43 = vmul.f32 %v1208_v19, %v1684_v36  ;;  %v655_v1 = vadd.f32 %v623_v41, %v581_v42  ;;  %1227 = vtanh.f32 %v642_v15 }
 0x17e   :  { %v1212_v45 = vpop.eup %1211  ;;  %v708_v61 = vmul.f32 %v1210_v37, %v1684_v36  ;;  %v745_v50 = vsel %vm203_vm0, %v703_v35, 0.0  ;;  %v626_v11 = vadd.f32 %v1729_v34, %v1643_v26  ;;  %v584_v62 = vmul.f32 %v1645_v27, %v1724_v32 }
 0x17f   :  { %743 = vadd.xlane.f32.xlu1 %v742_v28  ;;  %782 = vadd.xlane.f32.xlu0 %v781_v8  ;;  %v1214_v51 = vpop.eup %1213  ;;  %v790_v5 = vsel %vm203_vm0, %v718_v43, 0.0  ;;  %v721_v16 = vmul.f32 %v1212_v45, %v1684_v36  ;;  %v567_v56 = vmul.f32 %v1645_v27, %v1722_v3  ;;  %v640_v0 = vadd.f32 %v608_v31, %v566_v52 }
 0x180   :  { %v1216_v54 = vpop.eup %1215  ;;  %v760_v40 = vsel %vm203_vm0, %v708_v61, 0.0  ;;  %v609_v53 = vadd.f32 %v1640_v25, %v1748_v47  ;;  %v653_v6 = vadd.f32 %v621_v29, %v579_v46  ;;  %1229 = vtanh.f32 %v655_v1 }
 0x181   :  { %v1218_v55 = vpop.eup %1217  ;;  %v706_v34 = vmul.f32 %v1214_v51, %v1684_v36  ;;  %v799_v9 = vsel %vm203_vm0, %v721_v16, 0.0  ;;  %v719_v10 = vmul.f32 %v1216_v54, %v1684_v36  ;;  %v658_v32 = vadd.f32 %v626_v11, %v584_v62 }
 0x182   :  { %v1220_v60 = vpop.eup %1219  ;;  %v569_v24 = vmul.f32 %v1645_v27, %v480_v30  ;;  %v709_v3 = vmul.f32 %v1218_v55, %v1684_v36  ;;  %1231 = vtanh.f32 %v640_v0  ;;  %v611_v47 = vadd.f32 %v1743_v44, %v1640_v25 }
 0x183   :  { %752 = vadd.xlane.f32.xlu1 %v751_v22  ;;  %797 = vadd.xlane.f32.xlu0 %v796_v49  ;;  %v641_v13 = vadd.f32 %v609_v53, %v567_v56  ;;  %v724_v63 = vmul.f32 %v1220_v60, %v1684_v36  ;;  %1233 = vtanh.f32 %v653_v6  ;;  %v582_v18 = vmul.f32 %v1645_v27, %v1668_v57 }
 0x184   :  { %v1222_v14 = vpop.eup %1221  ;;  %v624_v7 = vadd.f32 %v1643_v26, %v1738_v59  ;;  %v754_v20 = vsel %vm203_vm0, %v706_v34, 0.0  ;;  %v793_v28 = vsel %vm203_vm0, %v719_v10, 0.0  ;;  %1235 = vtanh.f32 %v658_v32 }
 0x185   :  { %v1224_v21 = vpop.eup %1223  ;;  %v729_v33 = vmul.f32 %v1222_v14, %v1684_v36  ;;  %v763_v44 = vsel %vm203_vm0, %v709_v3, 0.0  ;;  %1237 = vtanh.f32 %v641_v13  ;;  %v643_v23 = vadd.f32 %v611_v47, %v569_v24 }
 0x186   :  { %v1226_v25 = vpop.eup %1225  ;;  %v808_v57 = vsel %vm203_vm0, %v724_v63, 0.0  ;;  %v583_v59 = vmul.f32 %v1645_v27, %v1688_v39  ;;  %v656_v58 = vadd.f32 %v624_v7, %v582_v18  ;;  %v625_v19 = vadd.f32 %v1643_v26, %v1750_v48 }
 0x187   :  { %746 = vadd.xlane.f32.xlu1 %v745_v50  ;;  %791 = vadd.xlane.f32.xlu0 %v790_v5  ;;  %v1228_v8 = vpop.eup %1227  ;;  %v707_v22 = vmul.f32 %v1224_v21, %v1684_v36  ;;  %v722_v12 = vmul.f32 %v1226_v25, %v1684_v36  ;;  %1239 = vtanh.f32 %v643_v23  ;;  %v823_v56 = vsel %vm203_vm0, %v729_v33, 0.0 }
 0x188   :  { %v712_v38 = vmul.f32 %v1228_v8, %v1684_v36  ;;  %1241 = vtanh.f32 %v656_v58  ;;  %v657_v49 = vadd.f32 %v625_v19, %v583_v59  ;;  %v1856_v63 = vand.u32 127, %v130_v2 }
 0x189   :  { %v757_v4 = vsel %vm203_vm0, %v707_v22, 0.0  ;;  %v802_v27 = vsel %vm203_vm0, %v722_v12, 0.0 }
 0x18a   :  { %v1230_v37 = vpop.eup %1229  ;;  %v772_v48 = vsel %vm203_vm0, %v712_v38, 0.0  ;;  %1243 = vtanh.f32 %v657_v49  ;;  %v864_v14 = vadd.s32 4294967288, %v1856_v63  ;;  %v862_v25 = vsub.s32 %v1856_v63, %v1574_v17 }
 0x18b   :  { %761 = vadd.xlane.f32.xlu1 %v760_v40  ;;  %800 = vadd.xlane.f32.xlu0 %v799_v9  ;;  %v725_v26 = vmul.f32 %v1230_v37, %v1684_v36  ;;  %v885_v2 = vadd.s32 4294967264, %v1856_v63 }
 0x18c   :  { %v1232_v41 = vpop.eup %1231 }
 0x18d   :  { %v1234_v39 = vpop.eup %1233  ;;  %v710_v35 = vmul.f32 %v1232_v41, %v1684_v36  ;;  %v811_v15 = vsel %vm203_vm0, %v725_v26, 0.0  ;;  %v888_v38 = vsub.s32 %v885_v2, %v1574_v17 }
 0x18e   :  { %v1236_v42 = vpop.eup %1235  ;;  %v723_v45 = vmul.f32 %v1234_v39, %v1684_v36 }
 0x18f   :  { %755 = vadd.xlane.f32.xlu1 %v754_v20  ;;  %794 = vadd.xlane.f32.xlu0 %v793_v28  ;;  %v1238_v43 = vpop.eup %1237  ;;  %v728_v61 = vmul.f32 %v1236_v42, %v1684_v36  ;;  %v766_v46 = vsel %vm203_vm0, %v710_v35, 0.0  ;;  %v867_v20 = vsub.s32 %v864_v14, %v1574_v17  ;;  %v871_v28 = vadd.s32 4294967280, %v1856_v63 }
 0x190   :  { %v711_v52 = vmul.f32 %v1238_v43, %v1684_v36  ;;  %v805_v29 = vsel %vm203_vm0, %v723_v45, 0.0  ;;  %v906_v35 = vadd.s32 4294967240, %v1856_v63  ;;  %v913_v43 = vadd.s32 4294967232, %v1856_v63 }
 0x191   :  { %v1240_v31 = vpop.eup %1239  ;;  %v820_v50 = vsel %vm203_vm0, %v728_v61, 0.0  ;;  %v874_v58 = vsub.s32 %v871_v28, %v1574_v17 }
 0x192   :  { %v1242_v1 = vpop.eup %1241  ;;  %v769_v51 = vsel %vm203_vm0, %v711_v52, 0.0  ;;  %v713_v5 = vmul.f32 %v1240_v31, %v1684_v36 }
 0x193   :  { %764 = vadd.xlane.f32.xlu1 %v763_v44  ;;  %809 = vadd.xlane.f32.xlu0 %v808_v57  ;;  %v726_v16 = vmul.f32 %v1242_v1, %v1684_v36  ;;  %v878_v44 = vadd.s32 4294967272, %v1856_v63  ;;  %v892_v57 = vadd.s32 4294967256, %v1856_v63 }
 0x194   :  { %v1244_v54 = vpop.eup %1243  ;;  %v775_v11 = vsel %vm203_vm0, %v713_v5, 0.0 }
 0x195   :  { %v814_v40 = vsel %vm203_vm0, %v726_v16, 0.0  ;;  %v727_v62 = vmul.f32 %v1244_v54, %v1684_v36  ;;  %v881_v37 = vsub.s32 %v878_v44, %v1574_v17  ;;  %v895_v41 = vsub.s32 %v892_v57, %v1574_v17 }
 0x197   :  { %758 = vadd.xlane.f32.xlu1 %v757_v4  ;;  %803 = vadd.xlane.f32.xlu0 %v802_v27  ;;  %v817_v55 = vsel %vm203_vm0, %v727_v62, 0.0  ;;  %v909_v62 = vsub.s32 %v906_v35, %v1574_v17  ;;  %vm1048_vm0 = vcmask 1041409  }
 0x19b   :  { %773 = vadd.xlane.f32.xlu1 %v772_v48  ;;  %812 = vadd.xlane.f32.xlu0 %v811_v15  ;;  %v899_v48 = vadd.s32 4294967248, %v1856_v63  ;;  %v920_v15 = vadd.s32 4294967224, %v1856_v63 }
 0x19d   :  { %v902_v5 = vsub.s32 %v899_v48, %v1574_v17 }
 0x19f   :  { %767 = vadd.xlane.f32.xlu1 %v766_v46  ;;  %806 = vadd.xlane.f32.xlu0 %v805_v29 }
 0x1a3   :  { %770 = vadd.xlane.f32.xlu1 %v769_v51  ;;  %821 = vadd.xlane.f32.xlu0 %v820_v50 }
 0x1a7   :  { %776 = vadd.xlane.f32.xlu1 %v775_v11  ;;  %815 = vadd.xlane.f32.xlu0 %v814_v40 }
 0x1ab   :  { %818 = vadd.xlane.f32.xlu0 %v817_v55 }
 0x1af   :  { %824 = vadd.xlane.f32.xlu0 %v823_v56  ;;  %v916_v56 = vsub.s32 %v913_v43, %v1574_v17 }
 0x1fb   :  { %v738_v0 = vpop.xlane.xlu1 %737 }
 0x1fc   :  { %v786_v53 = vpop.xlane.xlu0 %785  ;;  %v875_v39 = vrot.slane %v738_v0, %v874_v58 }
 0x1fd   :  { %v981_v26 = vrot.slane %v786_v53, %v874_v58 }
 0x200   :  { %v741_v30 = vpop.xlane.xlu1 %740  ;;  %v732_v60 = vpop.xlane.xlu0 %731 }
 0x201   :  { %v863_v22 = vrot.slane %v732_v60, %v862_v25  ;;  %v882_v31 = vrot.slane %v741_v30, %v881_v37  ;;  %v923_v30 = vsub.s32 %v920_v15, %v1574_v17 }
 0x204   :  { %v735_v6 = vpop.xlane.xlu1 %734  ;;  %v780_v34 = vpop.xlane.xlu0 %779 }
 0x205   :  { %v868_v8 = vrot.slane %v735_v6, %v867_v20  ;;  %v972_v12 = vrot.slane %v780_v34, %v862_v25  ;;  %v927_v34 = vadd.s32 4294967216, %v1856_v63 }
 0x207   :  { %v870_v49 = vsel %vm869_vm1, %v868_v8, %v863_v22  ;;  %v930_v2 = vsub.s32 %v927_v34, %v1574_v17 }
 0x208   :  { %v1849_v9 = vpop.xlane.xlu1 %749  ;;  %v789_v10 = vpop.xlane.xlu0 %788  ;;  %v877_v45 = vsel %vm876_vm2, %v875_v39, %v870_v49 }
 0x209   :  { %v986_v29 = vrot.slane %v789_v10, %v881_v37  ;;  %v884_v54 = vsel %vm883_vm3, %v882_v31, %v877_v45  ;;  %v903_v60 = vrot.slane %v1849_v9, %v902_v5 }
 0x20c   :  { %v744_v32 = vpop.xlane.xlu1 %743  ;;  %v783_v24 = vpop.xlane.xlu0 %782 }
 0x20d   :  { %v976_v23 = vrot.slane %v783_v24, %v867_v20  ;;  %v889_v46 = vrot.slane %v744_v32, %v888_v38  ;;  %v934_v24 = vadd.s32 4294967208, %v1856_v63 }
 0x20f   :  { %v977_v4 = vsel %vm869_vm1, %v976_v23, %v972_v12  ;;  %v891_v40 = vsel %vm890_vm4, %v889_v46, %v884_v54  ;;  %v937_v57 = vsub.s32 %v934_v24, %v1574_v17 }
 0x210   :  { %v1851_v3 = vpop.xlane.xlu1 %752  ;;  %v1853_v36 = vpop.xlane.xlu0 %797  ;;  %v982_v61 = vsel %vm876_vm2, %v981_v26, %v977_v4  ;;  %v962_v4 = vadd.s32 4294967176, %v1856_v63  ;;  %vm1056_vm2 = vcmask 1041408  }
 0x211   :  { %v987_v11 = vsel %vm883_vm3, %v986_v29, %v982_v61  ;;  %v1001_v6 = vrot.slane %v1853_v36, %v902_v5  ;;  %v910_v9 = vrot.slane %v1851_v3, %v909_v62 }
 0x214   :  { %v747_v47 = vpop.xlane.xlu1 %746  ;;  %v792_v13 = vpop.xlane.xlu0 %791 }
 0x215   :  { %v991_v52 = vrot.slane %v792_v13, %v888_v38  ;;  %v896_v1 = vrot.slane %v747_v47, %v895_v41  ;;  %v941_v47 = vadd.s32 4294967200, %v1856_v63  ;;  %v948_v13 = vadd.s32 4294967192, %v1856_v63 }
 0x217   :  { %v992_v55 = vsel %vm890_vm4, %v991_v52, %v987_v11  ;;  %v898_v0 = vsel %vm897_vm5, %v896_v1, %v891_v40  ;;  %v951_v49 = vsub.s32 %v948_v13, %v1574_v17 }
 0x218   :  { %v1859_v18 = vpop.xlane.xlu1 %761  ;;  %v1861_v7 = vpop.xlane.xlu0 %800  ;;  %v905_v14 = vsel %vm904_vm6, %v903_v60, %v898_v0 }
 0x219   :  { %v1006_v36 = vrot.slane %v1861_v7, %v909_v62  ;;  %v912_v23 = vsel %vm911_vm7, %v910_v9, %v905_v14  ;;  %v944_v7 = vsub.s32 %v941_v47, %v1574_v17 }
 0x21c   :  { %v1864_v21 = vpop.xlane.xlu1 %755  ;;  %v795_v33 = vpop.xlane.xlu0 %794 }
 0x21d   :  { %v996_v50 = vrot.slane %v795_v33, %v895_v41  ;;  %v917_v28 = vrot.slane %v1864_v21, %v916_v56  ;;  %v955_v21 = vadd.s32 4294967184, %v1856_v63  ;;  %v931_v41 = vrot.slane %v1859_v18, %v930_v2 }
 0x21e   :  { %v965_v63 = vsub.s32 %v962_v4, %v1574_v17 }
 0x21f   :  { %v997_v53 = vsel %vm897_vm5, %v996_v50, %v992_v55  ;;  %v919_v22 = vsel %vm918_vm8, %v917_v28, %v912_v23  ;;  %v958_v39 = vsub.s32 %v955_v21, %v1574_v17 }
 0x220   :  { %v1872_v59 = vpop.xlane.xlu1 %764  ;;  %v1875_v19 = vpop.xlane.xlu0 %809  ;;  %v1002_v20 = vsel %vm904_vm6, %v1001_v6, %v997_v53 }
 0x221   :  { %v1007_v58 = vsel %vm911_vm7, %v1006_v36, %v1002_v20  ;;  %v938_v15 = vrot.slane %v1872_v59, %v937_v57 }
 0x224   :  { %v1880_v27 = vpop.xlane.xlu1 %758  ;;  %v804_v42 = vpop.xlane.xlu0 %803 }
 0x225   :  { %v1011_v33 = vrot.slane %v804_v42, %v916_v56  ;;  %v924_v25 = vrot.slane %v1880_v27, %v923_v30  ;;  %v1021_v27 = vrot.slane %v1875_v19, %v930_v2 }
 0x227   :  { %v1012_v3 = vsel %vm918_vm8, %v1011_v33, %v1007_v58  ;;  %v926_v37 = vsel %vm925_vm9, %v924_v25, %v919_v22 }
 0x228   :  { %v1886_v51 = vpop.xlane.xlu1 %773  ;;  %v1889_v16 = vpop.xlane.xlu0 %812  ;;  %v933_v48 = vsel %vm932_vm10, %v931_v41, %v926_v37 }
 0x229   :  { %v1026_v45 = vrot.slane %v1889_v16, %v937_v57  ;;  %v940_v19 = vsel %vm939_vm11, %v938_v15, %v933_v48  ;;  %v959_v29 = vrot.slane %v1886_v51, %v958_v39  ;;  %v1052_v51 = vld [vmem:[#allocation9] sm:$0x3] }
 0x22a   :  { %vm1053_vm1 = vcmp.ne.s32.totalorder %v1052_v51, 0 }
 0x22c   :  { %v807_v10 = vpop.xlane.xlu0 %806  ;;  %v768_v32 = vpop.xlane.xlu1 %767 }
 0x22d   :  { %v1016_v44 = vrot.slane %v807_v10, %v923_v30  ;;  %v945_v35 = vrot.slane %v768_v32, %v944_v7 }
 0x22f   :  { %v1017_v38 = vsel %vm925_vm9, %v1016_v44, %v1012_v3  ;;  %v947_v1 = vsel %vm946_vm12, %v945_v35, %v940_v19 }
 0x230   :  { %v822_v8 = vpop.xlane.xlu0 %821  ;;  %v771_v12 = vpop.xlane.xlu1 %770  ;;  %v1022_v42 = vsel %vm932_vm10, %v1021_v27, %v1017_v38 }
 0x231   :  { %v952_v61 = vrot.slane %v771_v12, %v951_v49  ;;  %v1027_v52 = vsel %vm939_vm11, %v1026_v45, %v1022_v42  ;;  %v1041_v16 = vrot.slane %v822_v8, %v958_v39 }
 0x233   :  { %v954_v5 = vsel %vm953_vm13, %v952_v61, %v947_v1 }
 0x234   :  { %v816_v26 = vpop.xlane.xlu0 %815  ;;  %v777_v18 = vpop.xlane.xlu1 %776  ;;  %v961_v40 = vsel %vm960_vm14, %v959_v29, %v954_v5 }
 0x235   :  { %v1031_v43 = vrot.slane %v816_v26, %v944_v7  ;;  %v966_v59 = vrot.slane %v777_v18, %v965_v63 }
 0x237   :  { %v1032_v50 = vsel %vm946_vm12, %v1031_v43, %v1027_v52  ;;  %v968_v55 = vsel %vm967_vm15, %v966_v59, %v961_v40 }
 0x238   :  { %v819_v46 = vpop.xlane.xlu0 %818 }
 0x239   :  { %v1036_v31 = vrot.slane %v819_v46, %v951_v49 }
 0x23b   :  { %v1037_v54 = vsel %vm953_vm13, %v1036_v31, %v1032_v50 }
 0x23c   :  { %v825_v11 = vpop.xlane.xlu0 %824  ;;  %v1042_v62 = vsel %vm960_vm14, %v1041_v16, %v1037_v54 }
 0x23d   :  { %v1046_v17 = vrot.slane %v825_v11, %v965_v63 }
 0x23f   :  { %v1047_v56 = vsel %vm967_vm15, %v1046_v17, %v1042_v62 }
 0x240   :  { %v1049_v0 = vsel %vm1048_vm0, %v1047_v56, %v968_v55 }
 0x241   :  { %1051 = vst [vmem:[#allocation2] sm:$0x3] %v1049_v0 }
 0x248   :  { %v1054_v53 = vld [vmem:[#allocation2] sm:$0x3] }
 0x249   :  { %v1055_v30 = vsel %vm1053_vm1, -inf, %v1054_v53 }
 0x24a   :  { %v1057_v60 = vsel %vm1056_vm2, %v1055_v30, -inf }
 0x24b   :  { %1058 = vmax.xlane.f32.xlu1 %v1057_v60 }
 0x2d8   :  { %v1059_v6 = vpop.xlane.xlu1 %1058 }
 0x2d9   :  { %v1060_v34 = vsub.f32 %v1055_v30, %v1059_v6 }
 0x2db   :  { %v1061_v10 = vmul.f32 1.442695, %v1060_v34 }
 0x2dd   :  { %1245 = vpow2.f32 %v1061_v10 }
 0x2e7   :  { %v1246_v32 = vpop.eup %1245 }
 0x2e8   :  { %v1063_v24 = vsel %vm1056_vm2, %v1246_v32, 0.0 }
 0x2e9   :  { %1064 = vadd.xlane.f32.xlu0 %v1063_v24 }
 0x376   :  { %v1065_v47 = vpop.xlane.xlu0 %1064 }
 0x377   :  { %1247 = vrcp.f32 %v1065_v47 }
 0x381   :  { %v1248_v13 = vpop.eup %1247 }
 0x382   :  { %v1067_v14 = vmul.f32 %v1248_v13, %v1246_v32 }
 0x384   :  { %1068 = vst [vmem:[#allocation15] sm:$0x3] %v1067_v14 }
 0x385   :  { %1414 = shalt.err (!%p1411_p4)
}
 0x386   :  { %s1415_s14 = scalar_lea.hbm %s1946_s7, 32 }
 0x387   :  { %p1416_p5 = scmp.ne.s32.totalorder %s1946_s7, %s1415_s14  ;;  %p1419_p6 = scmp.lt.u32.totalorder %s1415_s14, %s1946_s7 }
 0x389   :  { %p1421_p7 = pnand %p1419_p6, %p1416_p5 }
 0x38b   :  { %1424 = shalt.err (!%p1421_p7)
}
 0x38c   :  { %1078 = dma.vmem_to_hbm [thread:$0]  %s1076_s0, 32, %s1946_s7, [#allocation5]  }
 0x38d   :  { %1433 = dma.done.wait [#allocation5], 32  }
 0x38e   :  { %1434 = vsyncadd [#allocation5], 4294967264 }
 0x38f   :  { %1082 = vsyncpa [#allocation4], 1 }
 0x390   :  { %1083 = vsyncpa [#allocation7], 1 }
 0x391   :  { %1084 = vsyncpa [#allocation10], 1 }
 0x392   :  { %1085 = vsyncpa [#allocation13], 1 }
 0x393   :  { %1086 = vsyncpa [#allocation5], 1 }

</bundles_post_ra>
